<compile_context>
chip_gen: v5e
topology: v5e:2x2
jax: 0.10.0
libtpu: 0.0.40
codegen_flags: <defaults>
</compile_context>

<pallas_src>
from functools import partial

import jax
import jax.numpy as jnp
from jax.experimental import pallas as pl
from jax.experimental.pallas import tpu as pltpu


def _conv_block_kernel(x_ref, w_ref, b_ref, o_ref, y_scr, *, H, W, pool, eps):
    # x_ref : (1, H+2, W+2, C_in)      padded NHWC image tile (compute dtype)
    # w_ref : (9, C_in, Co_pad)        tap-major conv weights (compute dtype)
    # b_ref : (1, Co_pad)              conv bias (f32, zero-padded lanes)
    # o_ref : (1, H//p, W//p, Co_pad)  pooled output (f32)
    # y_scr : (H*W, Co_pad) f32        conv accumulator / normalized-activation scratch
    Hp, Wp = H // pool, W // pool
    C_in = x_ref.shape[-1]
    Co = o_ref.shape[-1]

    # ---- Conv2d 3x3 (padding=1): in-kernel im2col as 9 accumulated MXU matmuls ----
    for t in range(9):
        dy, dx = divmod(t, 3)
        tap = x_ref[0, pl.ds(dy, H), pl.ds(dx, W), :]          # (H, W, C_in)
        tap = tap.reshape(H * W, C_in)
        contrib = jnp.dot(tap, w_ref[t], preferred_element_type=jnp.float32)
        if t == 0:
            y_scr[...] = contrib + b_ref[...]                  # conv bias
        else:
            y_scr[...] = y_scr[...] + contrib

    # ---- InstanceNorm2d (affine=False, biased variance, eps inside rsqrt) ----
    # One-pass stats: sum and sum-of-squares over the spatial rows (per channel column).
    acc = y_scr[...]                                           # (H*W, Co) f32
    inv_hw = 1.0 / float(H * W)
    mean = jnp.sum(acc, axis=0, keepdims=True) * inv_hw        # (1, Co)
    mean_sq = jnp.sum(acc * acc, axis=0, keepdims=True) * inv_hw
    var = mean_sq - mean * mean
    y = (acc - mean) * jax.lax.rsqrt(var + eps)

    # ---- ReLU ----
    y = jnp.maximum(y, 0.0)
    # TODO(synk): Dropout2d with drop_prob > 0 (training-mode channel dropout) is not
    # implemented; with the module default drop_prob=0 it is an exact identity.

    # ---- MaxPool2d(pool) ----
    if pool == 1:
        o_ref[0] = y.reshape(Hp, Wp, Co).astype(o_ref.dtype)
        return

    y_scr[...] = y
    # W direction: rows are raster ordered (r = h*W + w); strided sublane reads pick
    # each within-window column offset j, giving rows ordered (h, wb).
    HWp = H * Wp
    pw = y_scr[pl.ds(0, HWp, stride=pool), :]
    for j in range(1, pool):
        pw = jnp.maximum(pw, y_scr[pl.ds(j, HWp, stride=pool), :])
    # H direction on the register-resident value: regroup the major row dim so the
    # `pool` source rows of each output row sit in contiguous sublane slices.
    pw = pw.reshape(Hp, pool * Wp, Co)                          # row = hb, col = i*Wp + wb
    pooled = pw[:, 0:Wp, :]
    for i in range(1, pool):
        pooled = jnp.maximum(pooled, pw[:, i * Wp:(i + 1) * Wp, :])
    o_ref[0] = pooled.astype(o_ref.dtype)


def single_conv_block(x, weight, bias, *, pool_size=2, eps=1e-5,
                      compute_dtype=jnp.bfloat16):
    """x: (N, C_in, H, W); weight: (C_out, C_in, 3, 3); bias: (C_out,). Returns NCHW."""
    N, C_in, H, W = x.shape
    C_out = weight.shape[0]
    p = pool_size if pool_size > 1 else 1
    assert H % p == 0 and W % p == 0
    Hp, Wp = H // p, W // p

    LANES = 128
    Co_pad = ((C_out + LANES - 1) // LANES) * LANES            # lane-dense output / MXU N

    # Layout glue only (no 9x patch materialization): NCHW -> zero-padded NHWC.
    xp = jnp.pad(x.transpose(0, 2, 3, 1), ((0, 0), (1, 1), (1, 1), (0, 0)))
    xp = xp.astype(compute_dtype)

    # (C_out, C_in, ky, kx) -> (9, C_in, Co_pad), tap index t = ky*3 + kx; zero-pad lanes.
    w = weight.transpose(2, 3, 1, 0).reshape(9, C_in, C_out)
    w = jnp.pad(w, ((0, 0), (0, 0), (0, Co_pad - C_out))).astype(compute_dtype)
    b = jnp.pad(bias, (0, Co_pad - C_out)).reshape(1, Co_pad).astype(jnp.float32)

    out = pl.pallas_call(
        partial(_conv_block_kernel, H=H, W=W, pool=p, eps=eps),
        out_shape=jax.ShapeDtypeStruct((N, Hp, Wp, Co_pad), jnp.float32),
        grid_spec=pltpu.PrefetchScalarGridSpec(
            num_scalar_prefetch=0,
            grid=(N,),
            in_specs=[
                pl.BlockSpec((1, H + 2, W + 2, C_in), lambda n: (n, 0, 0, 0)),
                pl.BlockSpec((9, C_in, Co_pad), lambda n: (0, 0, 0)),
                pl.BlockSpec((1, Co_pad), lambda n: (0, 0)),
            ],
            out_specs=pl.BlockSpec((1, Hp, Wp, Co_pad), lambda n: (n, 0, 0, 0)),
            scratch_shapes=[pltpu.VMEM((H * W, Co_pad), jnp.float32)],
        ),
        compiler_params=pltpu.CompilerParams(
            dimension_semantics=("parallel",),
            vmem_limit_bytes=32 * 1024 * 1024,
        ),
    )(xp, w, b)

    # Drop the lane padding and go back to NCHW: (N, C_out, H//p, W//p).
    return out[..., :C_out].transpose(0, 3, 1, 2)


def _reference(x, weight, bias, *, pool_size=2, eps=1e-5):
    y = jax.lax.conv_general_dilated(
        x, weight, window_strides=(1, 1), padding=((1, 1), (1, 1)),
        dimension_numbers=("NCHW", "OIHW", "NCHW"))
    y = y + bias[None, :, None, None]
    mean = jnp.mean(y, axis=(2, 3), keepdims=True)
    var = jnp.mean((y - mean) ** 2, axis=(2, 3), keepdims=True)
    y = (y - mean) * jax.lax.rsqrt(var + eps)
    y = jnp.maximum(y, 0.0)
    if pool_size > 1:
        N, C, H, W = y.shape
        p = pool_size
        y = y.reshape(N, C, H // p, p, W // p, p).max(axis=(3, 5))
    return y


if __name__ == "__main__":
    key = jax.random.PRNGKey(0)
    k1, k2, k3 = jax.random.split(key, 3)

    N, C_in, C_out, H, W = 2, 4, 8, 16, 16
    pool_size = 2

    x = jax.random.normal(k1, (N, C_in, H, W), dtype=jnp.float32)
    weight = 0.1 * jax.random.normal(k2, (C_out, C_in, 3, 3), dtype=jnp.float32)
    bias = 0.1 * jax.random.normal(k3, (C_out,), dtype=jnp.float32)

    ref = _reference(x, weight, bias, pool_size=pool_size)

    # Exact-precision path (f32 MXU operands): tight check against the f32 reference.
    out_f32 = single_conv_block(x, weight, bias, pool_size=pool_size,
                                compute_dtype=jnp.float32)
    out_f32 = jax.block_until_ready(out_f32)
    assert out_f32.shape == (N, C_out, H // pool_size, W // pool_size), out_f32.shape
    assert jnp.allclose(out_f32, ref, atol=1e-3, rtol=1e-3), \
        float(jnp.max(jnp.abs(out_f32 - ref)))

    # Fast path (bf16 MXU operands, f32 accumulation -- v6e/v7x MXU peak): looser tol.
    out_bf16 = single_conv_block(x, weight, bias, pool_size=pool_size,
                                 compute_dtype=jnp.bfloat16)
    out_bf16 = jax.block_until_ready(out_bf16)
    assert out_bf16.shape == (N, C_out, H // pool_size, W // pool_size), out_bf16.shape
    assert jnp.allclose(out_bf16, ref, atol=5e-2, rtol=5e-2), \
        float(jnp.max(jnp.abs(out_bf16 - ref)))

    print("KERNEL_OK")
</pallas_src>

<mosaic_0001>
module attributes {stable_mosaic.version = 11 : i64} {
  func.func @_conv_block_kernel(%arg0: i32, %arg1: memref<1x18x18x4xf32, #tpu.memory_space<vmem>>, %arg2: memref<9x4x128xf32, #tpu.memory_space<vmem>>, %arg3: memref<1x128xf32, #tpu.memory_space<vmem>>, %arg4: memref<1x8x8x128xf32, #tpu.memory_space<vmem>>, %arg5: memref<256x128xf32, #tpu.memory_space<vmem>>) attributes {dimension_semantics = [#tpu.dimension_semantics<parallel>], iteration_bounds = array<i64: 2>, scalar_prefetch = 0 : i64, scratch_operands = 1 : i64, tpu.core_type = #tpu.core_type<tc>, window_params = [{transform_indices = @transform_0, window_bounds = array<i64: 1, 18, 18, 4>}, {pipeline_mode = #tpu.pipeline_mode<synchronous>, transform_indices = @transform_1, window_bounds = array<i64: 9, 4, 128>}, {pipeline_mode = #tpu.pipeline_mode<synchronous>, transform_indices = @transform_2, window_bounds = array<i64: 1, 128>}, {transform_indices = @transform_3, window_bounds = array<i64: 1, 8, 8, 128>}]} {
    %c0 = arith.constant 0 : index
    %c0_0 = arith.constant 0 : index
    %c0_1 = arith.constant 0 : index
    %c0_2 = arith.constant 0 : index
    %0 = vector.load %arg1[%c0, %c0_0, %c0_1, %c0_2] : memref<1x18x18x4xf32, #tpu.memory_space<vmem>>, vector<1x16x16x4xf32>
    %1 = vector.shape_cast %0 : vector<1x16x16x4xf32> to vector<16x16x4xf32>
    %2 = vector.shape_cast %1 : vector<16x16x4xf32> to vector<256x4xf32>
    %c0_3 = arith.constant 0 : index
    %c0_4 = arith.constant 0 : index
    %c0_5 = arith.constant 0 : index
    %3 = vector.load %arg2[%c0_3, %c0_4, %c0_5] : memref<9x4x128xf32, #tpu.memory_space<vmem>>, vector<1x4x128xf32>
    %4 = vector.shape_cast %3 : vector<1x4x128xf32> to vector<4x128xf32>
    %cst = arith.constant dense<0.000000e+00> : vector<256x128xf32>
    %5 = tpu.matmul %2, %4, %cst {dimension_numbers = #tpu.dot_dimension_numbers<[1], [0], [0], [1], [0, 0, 1, 1], [], []>} : vector<256x4xf32>, vector<4x128xf32>, vector<256x128xf32> -> vector<256x128xf32>
    %c0_6 = arith.constant 0 : index
    %c0_7 = arith.constant 0 : index
    %6 = vector.load %arg3[%c0_6, %c0_7] : memref<1x128xf32, #tpu.memory_space<vmem>>, vector<1x128xf32>
    %7 = vector.broadcast %6 : vector<1x128xf32> to vector<256x128xf32>
    %8 = arith.addf %5, %7 : vector<256x128xf32>
    %c0_8 = arith.constant 0 : index
    %c0_9 = arith.constant 0 : index
    %9 = vector.load %arg5[%c0_8, %c0_9] : memref<256x128xf32, #tpu.memory_space<vmem>>, vector<256x128xf32>
    tpu.vector_store %arg5[%c0_8, %c0_9], %8 {strides = array<i32>} : memref<256x128xf32, #tpu.memory_space<vmem>>, vector<256x128xf32>,
    %c0_10 = arith.constant 0 : index
    %c0_11 = arith.constant 0 : index
    %c1 = arith.constant 1 : index
    %c0_12 = arith.constant 0 : index
    %10 = vector.load %arg1[%c0_10, %c0_11, %c1, %c0_12] : memref<1x18x18x4xf32, #tpu.memory_space<vmem>>, vector<1x16x16x4xf32>
    %11 = vector.shape_cast %10 : vector<1x16x16x4xf32> to vector<16x16x4xf32>
    %12 = vector.shape_cast %11 : vector<16x16x4xf32> to vector<256x4xf32>
    %c1_13 = arith.constant 1 : index
    %c0_14 = arith.constant 0 : index
    %c0_15 = arith.constant 0 : index
    %13 = vector.load %arg2[%c1_13, %c0_14, %c0_15] : memref<9x4x128xf32, #tpu.memory_space<vmem>>, vector<1x4x128xf32>
    %14 = vector.shape_cast %13 : vector<1x4x128xf32> to vector<4x128xf32>
    %cst_16 = arith.constant dense<0.000000e+00> : vector<256x128xf32>
    %15 = tpu.matmul %12, %14, %cst_16 {dimension_numbers = #tpu.dot_dimension_numbers<[1], [0], [0], [1], [0, 0, 1, 1], [], []>} : vector<256x4xf32>, vector<4x128xf32>, vector<256x128xf32> -> vector<256x128xf32>
    %c0_17 = arith.constant 0 : index
    %c0_18 = arith.constant 0 : index
    %16 = vector.load %arg5[%c0_17, %c0_18] : memref<256x128xf32, #tpu.memory_space<vmem>>, vector<256x128xf32>
    %17 = arith.addf %16, %15 : vector<256x128xf32>
    %c0_19 = arith.constant 0 : index
    %c0_20 = arith.constant 0 : index
    %18 = vector.load %arg5[%c0_19, %c0_20] : memref<256x128xf32, #tpu.memory_space<vmem>>, vector<256x128xf32>
    tpu.vector_store %arg5[%c0_19, %c0_20], %17 {strides = array<i32>} : memref<256x128xf32, #tpu.memory_space<vmem>>, vector<256x128xf32>,
    %c0_21 = arith.constant 0 : index
    %c0_22 = arith.constant 0 : index
    %c2 = arith.constant 2 : index
    %c0_23 = arith.constant 0 : index
    %19 = vector.load %arg1[%c0_21, %c0_22, %c2, %c0_23] : memref<1x18x18x4xf32, #tpu.memory_space<vmem>>, vector<1x16x16x4xf32>
    %20 = vector.shape_cast %19 : vector<1x16x16x4xf32> to vector<16x16x4xf32>
    %21 = vector.shape_cast %20 : vector<16x16x4xf32> to vector<256x4xf32>
    %c2_24 = arith.constant 2 : index
    %c0_25 = arith.constant 0 : index
    %c0_26 = arith.constant 0 : index
    %22 = vector.load %arg2[%c2_24, %c0_25, %c0_26] : memref<9x4x128xf32, #tpu.memory_space<vmem>>, vector<1x4x128xf32>
    %23 = vector.shape_cast %22 : vector<1x4x128xf32> to vector<4x128xf32>
    %cst_27 = arith.constant dense<0.000000e+00> : vector<256x128xf32>
    %24 = tpu.matmul %21, %23, %cst_27 {dimension_numbers = #tpu.dot_dimension_numbers<[1], [0], [0], [1], [0, 0, 1, 1], [], []>} : vector<256x4xf32>, vector<4x128xf32>, vector<256x128xf32> -> vector<256x128xf32>
    %c0_28 = arith.constant 0 : index
    %c0_29 = arith.constant 0 : index
    %25 = vector.load %arg5[%c0_28, %c0_29] : memref<256x128xf32, #tpu.memory_space<vmem>>, vector<256x128xf32>
    %26 = arith.addf %25, %24 : vector<256x128xf32>
    %c0_30 = arith.constant 0 : index
    %c0_31 = arith.constant 0 : index
    %27 = vector.load %arg5[%c0_30, %c0_31] : memref<256x128xf32, #tpu.memory_space<vmem>>, vector<256x128xf32>
    tpu.vector_store %arg5[%c0_30, %c0_31], %26 {strides = array<i32>} : memref<256x128xf32, #tpu.memory_space<vmem>>, vector<256x128xf32>,
    %c0_32 = arith.constant 0 : index
    %c1_33 = arith.constant 1 : index
    %c0_34 = arith.constant 0 : index
    %c0_35 = arith.constant 0 : index
    %28 = vector.load %arg1[%c0_32, %c1_33, %c0_34, %c0_35] : memref<1x18x18x4xf32, #tpu.memory_space<vmem>>, vector<1x16x16x4xf32>
    %29 = vector.shape_cast %28 : vector<1x16x16x4xf32> to vector<16x16x4xf32>
    %30 = vector.shape_cast %29 : vector<16x16x4xf32> to vector<256x4xf32>
    %c3 = arith.constant 3 : index
    %c0_36 = arith.constant 0 : index
    %c0_37 = arith.constant 0 : index
    %31 = vector.load %arg2[%c3, %c0_36, %c0_37] : memref<9x4x128xf32, #tpu.memory_space<vmem>>, vector<1x4x128xf32>
    %32 = vector.shape_cast %31 : vector<1x4x128xf32> to vector<4x128xf32>
    %cst_38 = arith.constant dense<0.000000e+00> : vector<256x128xf32>
    %33 = tpu.matmul %30, %32, %cst_38 {dimension_numbers = #tpu.dot_dimension_numbers<[1], [0], [0], [1], [0, 0, 1, 1], [], []>} : vector<256x4xf32>, vector<4x128xf32>, vector<256x128xf32> -> vector<256x128xf32>
    %c0_39 = arith.constant 0 : index
    %c0_40 = arith.constant 0 : index
    %34 = vector.load %arg5[%c0_39, %c0_40] : memref<256x128xf32, #tpu.memory_space<vmem>>, vector<256x128xf32>
    %35 = arith.addf %34, %33 : vector<256x128xf32>
    %c0_41 = arith.constant 0 : index
    %c0_42 = arith.constant 0 : index
    %36 = vector.load %arg5[%c0_41, %c0_42] : memref<256x128xf32, #tpu.memory_space<vmem>>, vector<256x128xf32>
    tpu.vector_store %arg5[%c0_41, %c0_42], %35 {strides = array<i32>} : memref<256x128xf32, #tpu.memory_space<vmem>>, vector<256x128xf32>,
    %c0_43 = arith.constant 0 : index
    %c1_44 = arith.constant 1 : index
    %c1_45 = arith.constant 1 : index
    %c0_46 = arith.constant 0 : index
    %37 = vector.load %arg1[%c0_43, %c1_44, %c1_45, %c0_46] : memref<1x18x18x4xf32, #tpu.memory_space<vmem>>, vector<1x16x16x4xf32>
    %38 = vector.shape_cast %37 : vector<1x16x16x4xf32> to vector<16x16x4xf32>
    %39 = vector.shape_cast %38 : vector<16x16x4xf32> to vector<256x4xf32>
    %c4 = arith.constant 4 : index
    %c0_47 = arith.constant 0 : index
    %c0_48 = arith.constant 0 : index
    %40 = vector.load %arg2[%c4, %c0_47, %c0_48] : memref<9x4x128xf32, #tpu.memory_space<vmem>>, vector<1x4x128xf32>
    %41 = vector.shape_cast %40 : vector<1x4x128xf32> to vector<4x128xf32>
    %cst_49 = arith.constant dense<0.000000e+00> : vector<256x128xf32>
    %42 = tpu.matmul %39, %41, %cst_49 {dimension_numbers = #tpu.dot_dimension_numbers<[1], [0], [0], [1], [0, 0, 1, 1], [], []>} : vector<256x4xf32>, vector<4x128xf32>, vector<256x128xf32> -> vector<256x128xf32>
    %c0_50 = arith.constant 0 : index
    %c0_51 = arith.constant 0 : index
    %43 = vector.load %arg5[%c0_50, %c0_51] : memref<256x128xf32, #tpu.memory_space<vmem>>, vector<256x128xf32>
    %44 = arith.addf %43, %42 : vector<256x128xf32>
    %c0_52 = arith.constant 0 : index
    %c0_53 = arith.constant 0 : index
    %45 = vector.load %arg5[%c0_52, %c0_53] : memref<256x128xf32, #tpu.memory_space<vmem>>, vector<256x128xf32>
    tpu.vector_store %arg5[%c0_52, %c0_53], %44 {strides = array<i32>} : memref<256x128xf32, #tpu.memory_space<vmem>>, vector<256x128xf32>,
    %c0_54 = arith.constant 0 : index
    %c1_55 = arith.constant 1 : index
    %c2_56 = arith.constant 2 : index
    %c0_57 = arith.constant 0 : index
    %46 = vector.load %arg1[%c0_54, %c1_55, %c2_56, %c0_57] : memref<1x18x18x4xf32, #tpu.memory_space<vmem>>, vector<1x16x16x4xf32>
    %47 = vector.shape_cast %46 : vector<1x16x16x4xf32> to vector<16x16x4xf32>
    %48 = vector.shape_cast %47 : vector<16x16x4xf32> to vector<256x4xf32>
    %c5 = arith.constant 5 : index
    %c0_58 = arith.constant 0 : index
    %c0_59 = arith.constant 0 : index
    %49 = vector.load %arg2[%c5, %c0_58, %c0_59] : memref<9x4x128xf32, #tpu.memory_space<vmem>>, vector<1x4x128xf32>
    %50 = vector.shape_cast %49 : vector<1x4x128xf32> to vector<4x128xf32>
    %cst_60 = arith.constant dense<0.000000e+00> : vector<256x128xf32>
    %51 = tpu.matmul %48, %50, %cst_60 {dimension_numbers = #tpu.dot_dimension_numbers<[1], [0], [0], [1], [0, 0, 1, 1], [], []>} : vector<256x4xf32>, vector<4x128xf32>, vector<256x128xf32> -> vector<256x128xf32>
    %c0_61 = arith.constant 0 : index
    %c0_62 = arith.constant 0 : index
    %52 = vector.load %arg5[%c0_61, %c0_62] : memref<256x128xf32, #tpu.memory_space<vmem>>, vector<256x128xf32>
    %53 = arith.addf %52, %51 : vector<256x128xf32>
    %c0_63 = arith.constant 0 : index
    %c0_64 = arith.constant 0 : index
    %54 = vector.load %arg5[%c0_63, %c0_64] : memref<256x128xf32, #tpu.memory_space<vmem>>, vector<256x128xf32>
    tpu.vector_store %arg5[%c0_63, %c0_64], %53 {strides = array<i32>} : memref<256x128xf32, #tpu.memory_space<vmem>>, vector<256x128xf32>,
    %c0_65 = arith.constant 0 : index
    %c2_66 = arith.constant 2 : index
    %c0_67 = arith.constant 0 : index
    %c0_68 = arith.constant 0 : index
    %55 = vector.load %arg1[%c0_65, %c2_66, %c0_67, %c0_68] : memref<1x18x18x4xf32, #tpu.memory_space<vmem>>, vector<1x16x16x4xf32>
    %56 = vector.shape_cast %55 : vector<1x16x16x4xf32> to vector<16x16x4xf32>
    %57 = vector.shape_cast %56 : vector<16x16x4xf32> to vector<256x4xf32>
    %c6 = arith.constant 6 : index
    %c0_69 = arith.constant 0 : index
    %c0_70 = arith.constant 0 : index
    %58 = vector.load %arg2[%c6, %c0_69, %c0_70] : memref<9x4x128xf32, #tpu.memory_space<vmem>>, vector<1x4x128xf32>
    %59 = vector.shape_cast %58 : vector<1x4x128xf32> to vector<4x128xf32>
    %cst_71 = arith.constant dense<0.000000e+00> : vector<256x128xf32>
    %60 = tpu.matmul %57, %59, %cst_71 {dimension_numbers = #tpu.dot_dimension_numbers<[1], [0], [0], [1], [0, 0, 1, 1], [], []>} : vector<256x4xf32>, vector<4x128xf32>, vector<256x128xf32> -> vector<256x128xf32>
    %c0_72 = arith.constant 0 : index
    %c0_73 = arith.constant 0 : index
    %61 = vector.load %arg5[%c0_72, %c0_73] : memref<256x128xf32, #tpu.memory_space<vmem>>, vector<256x128xf32>
    %62 = arith.addf %61, %60 : vector<256x128xf32>
    %c0_74 = arith.constant 0 : index
    %c0_75 = arith.constant 0 : index
    %63 = vector.load %arg5[%c0_74, %c0_75] : memref<256x128xf32, #tpu.memory_space<vmem>>, vector<256x128xf32>
    tpu.vector_store %arg5[%c0_74, %c0_75], %62 {strides = array<i32>} : memref<256x128xf32, #tpu.memory_space<vmem>>, vector<256x128xf32>,
    %c0_76 = arith.constant 0 : index
    %c2_77 = arith.constant 2 : index
    %c1_78 = arith.constant 1 : index
    %c0_79 = arith.constant 0 : index
    %64 = vector.load %arg1[%c0_76, %c2_77, %c1_78, %c0_79] : memref<1x18x18x4xf32, #tpu.memory_space<vmem>>, vector<1x16x16x4xf32>
    %65 = vector.shape_cast %64 : vector<1x16x16x4xf32> to vector<16x16x4xf32>
    %66 = vector.shape_cast %65 : vector<16x16x4xf32> to vector<256x4xf32>
    %c7 = arith.constant 7 : index
    %c0_80 = arith.constant 0 : index
    %c0_81 = arith.constant 0 : index
    %67 = vector.load %arg2[%c7, %c0_80, %c0_81] : memref<9x4x128xf32, #tpu.memory_space<vmem>>, vector<1x4x128xf32>
    %68 = vector.shape_cast %67 : vector<1x4x128xf32> to vector<4x128xf32>
    %cst_82 = arith.constant dense<0.000000e+00> : vector<256x128xf32>
    %69 = tpu.matmul %66, %68, %cst_82 {dimension_numbers = #tpu.dot_dimension_numbers<[1], [0], [0], [1], [0, 0, 1, 1], [], []>} : vector<256x4xf32>, vector<4x128xf32>, vector<256x128xf32> -> vector<256x128xf32>
    %c0_83 = arith.constant 0 : index
    %c0_84 = arith.constant 0 : index
    %70 = vector.load %arg5[%c0_83, %c0_84] : memref<256x128xf32, #tpu.memory_space<vmem>>, vector<256x128xf32>
    %71 = arith.addf %70, %69 : vector<256x128xf32>
    %c0_85 = arith.constant 0 : index
    %c0_86 = arith.constant 0 : index
    %72 = vector.load %arg5[%c0_85, %c0_86] : memref<256x128xf32, #tpu.memory_space<vmem>>, vector<256x128xf32>
    tpu.vector_store %arg5[%c0_85, %c0_86], %71 {strides = array<i32>} : memref<256x128xf32, #tpu.memory_space<vmem>>, vector<256x128xf32>,
    %c0_87 = arith.constant 0 : index
    %c2_88 = arith.constant 2 : index
    %c2_89 = arith.constant 2 : index
    %c0_90 = arith.constant 0 : index
    %73 = vector.load %arg1[%c0_87, %c2_88, %c2_89, %c0_90] : memref<1x18x18x4xf32, #tpu.memory_space<vmem>>, vector<1x16x16x4xf32>
    %74 = vector.shape_cast %73 : vector<1x16x16x4xf32> to vector<16x16x4xf32>
    %75 = vector.shape_cast %74 : vector<16x16x4xf32> to vector<256x4xf32>
    %c8 = arith.constant 8 : index
    %c0_91 = arith.constant 0 : index
    %c0_92 = arith.constant 0 : index
    %76 = vector.load %arg2[%c8, %c0_91, %c0_92] : memref<9x4x128xf32, #tpu.memory_space<vmem>>, vector<1x4x128xf32>
    %77 = vector.shape_cast %76 : vector<1x4x128xf32> to vector<4x128xf32>
    %cst_93 = arith.constant dense<0.000000e+00> : vector<256x128xf32>
    %78 = tpu.matmul %75, %77, %cst_93 {dimension_numbers = #tpu.dot_dimension_numbers<[1], [0], [0], [1], [0, 0, 1, 1], [], []>} : vector<256x4xf32>, vector<4x128xf32>, vector<256x128xf32> -> vector<256x128xf32>
    %c0_94 = arith.constant 0 : index
    %c0_95 = arith.constant 0 : index
    %79 = vector.load %arg5[%c0_94, %c0_95] : memref<256x128xf32, #tpu.memory_space<vmem>>, vector<256x128xf32>
    %80 = arith.addf %79, %78 : vector<256x128xf32>
    %c0_96 = arith.constant 0 : index
    %c0_97 = arith.constant 0 : index
    %81 = vector.load %arg5[%c0_96, %c0_97] : memref<256x128xf32, #tpu.memory_space<vmem>>, vector<256x128xf32>
    tpu.vector_store %arg5[%c0_96, %c0_97], %80 {strides = array<i32>} : memref<256x128xf32, #tpu.memory_space<vmem>>, vector<256x128xf32>,
    %c0_98 = arith.constant 0 : index
    %c0_99 = arith.constant 0 : index
    %82 = vector.load %arg5[%c0_98, %c0_99] : memref<256x128xf32, #tpu.memory_space<vmem>>, vector<256x128xf32>
    %cst_100 = arith.constant dense<0.000000e+00> : vector<128xf32>
    %83 = vector.multi_reduction <add>, %82, %cst_100 [0] : vector<256x128xf32> to vector<128xf32>
    %84 = vector.shape_cast %83 : vector<128xf32> to vector<1x128xf32>
    %cst_101 = arith.constant 3.906250e-03 : f32
    %85 = vector.broadcast %cst_101 : f32 to vector<1x128xf32>
    %86 = arith.mulf %84, %85 : vector<1x128xf32>
    %87 = arith.mulf %82, %82 : vector<256x128xf32>
    %cst_102 = arith.constant dense<0.000000e+00> : vector<128xf32>
    %88 = vector.multi_reduction <add>, %87, %cst_102 [0] : vector<256x128xf32> to vector<128xf32>
    %89 = vector.shape_cast %88 : vector<128xf32> to vector<1x128xf32>
    %cst_103 = arith.constant 3.906250e-03 : f32
    %90 = vector.broadcast %cst_103 : f32 to vector<1x128xf32>
    %91 = arith.mulf %89, %90 : vector<1x128xf32>
    %92 = arith.mulf %86, %86 : vector<1x128xf32>
    %93 = arith.subf %91, %92 : vector<1x128xf32>
    %94 = vector.broadcast %86 : vector<1x128xf32> to vector<256x128xf32>
    %95 = arith.subf %82, %94 : vector<256x128xf32>
    %cst_104 = arith.constant 9.99999974E-6 : f32
    %96 = vector.broadcast %cst_104 : f32 to vector<1x128xf32>
    %97 = arith.addf %93, %96 : vector<1x128xf32>
    %98 = math.rsqrt %97 : vector<1x128xf32>
    %99 = vector.broadcast %98 : vector<1x128xf32> to vector<256x128xf32>
    %100 = arith.mulf %95, %99 : vector<256x128xf32>
    %cst_105 = arith.constant 0.000000e+00 : f32
    %101 = vector.broadcast %cst_105 : f32 to vector<256x128xf32>
    %102 = arith.maximumf %100, %101 : vector<256x128xf32>
    %c0_106 = arith.constant 0 : index
    %c0_107 = arith.constant 0 : index
    %103 = vector.load %arg5[%c0_106, %c0_107] : memref<256x128xf32, #tpu.memory_space<vmem>>, vector<256x128xf32>
    tpu.vector_store %arg5[%c0_106, %c0_107], %102 {strides = array<i32>} : memref<256x128xf32, #tpu.memory_space<vmem>>, vector<256x128xf32>,
    %c0_108 = arith.constant 0 : index
    %c0_109 = arith.constant 0 : index
    %104 = tpu.strided_load %arg5[%c0_108, %c0_109] {strides = array<i32: 2, 1>} : memref<256x128xf32, #tpu.memory_space<vmem>>, vector<128x128xf32>
    %c1_110 = arith.constant 1 : index
    %c0_111 = arith.constant 0 : index
    %105 = tpu.strided_load %arg5[%c1_110, %c0_111] {strides = array<i32: 2, 1>} : memref<256x128xf32, #tpu.memory_space<vmem>>, vector<128x128xf32>
    %106 = arith.maximumf %104, %105 : vector<128x128xf32>
    %107 = vector.shape_cast %106 : vector<128x128xf32> to vector<8x16x128xf32>
    %108 = vector.extract_strided_slice %107 {offsets = [0, 0, 0], sizes = [8, 8, 128], strides = [1, 1, 1]} : vector<8x16x128xf32> to vector<8x8x128xf32>
    %109 = vector.extract_strided_slice %107 {offsets = [0, 8, 0], sizes = [8, 8, 128], strides = [1, 1, 1]} : vector<8x16x128xf32> to vector<8x8x128xf32>
    %110 = arith.maximumf %108, %109 : vector<8x8x128xf32>
    %c0_112 = arith.constant 0 : index
    %c0_113 = arith.constant 0 : index
    %c0_114 = arith.constant 0 : index
    %c0_115 = arith.constant 0 : index
    %111 = vector.load %arg4[%c0_112, %c0_113, %c0_114, %c0_115] : memref<1x8x8x128xf32, #tpu.memory_space<vmem>>, vector<1x8x8x128xf32>
    %112 = vector.shape_cast %111 : vector<1x8x8x128xf32> to vector<8x8x128xf32>
    %113 = vector.shape_cast %110 : vector<8x8x128xf32> to vector<1x8x8x128xf32>
    tpu.vector_store %arg4[%c0_112, %c0_113, %c0_114, %c0_115], %113 {strides = array<i32>} : memref<1x8x8x128xf32, #tpu.memory_space<vmem>>, vector<1x8x8x128xf32>,
    return
  }
  func.func @transform_0(%arg0: i32) -> (i32, i32, i32, i32) {
    %c0_i32 = arith.constant 0 : i32
    %c0_i32_0 = arith.constant 0 : i32
    %c0_i32_1 = arith.constant 0 : i32
    %c0_i32_2 = arith.constant 0 : i32
    return %arg0, %c0_i32, %c0_i32_0, %c0_i32_1 : i32, i32, i32, i32
  }
  func.func @transform_1(%arg0: i32) -> (i32, i32, i32) {
    %c0_i32 = arith.constant 0 : i32
    %c0_i32_0 = arith.constant 0 : i32
    %c0_i32_1 = arith.constant 0 : i32
    %c0_i32_2 = arith.constant 0 : i32
    return %c0_i32, %c0_i32_0, %c0_i32_1 : i32, i32, i32
  }
  func.func @transform_2(%arg0: i32) -> (i32, i32) {
    %c0_i32 = arith.constant 0 : i32
    %c0_i32_0 = arith.constant 0 : i32
    %c0_i32_1 = arith.constant 0 : i32
    return %c0_i32, %c0_i32_0 : i32, i32
  }
  func.func @transform_3(%arg0: i32) -> (i32, i32, i32, i32) {
    %c0_i32 = arith.constant 0 : i32
    %c0_i32_0 = arith.constant 0 : i32
    %c0_i32_1 = arith.constant 0 : i32
    %c0_i32_2 = arith.constant 0 : i32
    return %arg0, %c0_i32, %c0_i32_0, %c0_i32_1 : i32, i32, i32, i32
  }
}

</mosaic_0001>

<bundles_post_ra>
// kernel: tpu_custom_call.1
= control target key start
LH: loop header
LB: loop body
LE: loop exit
PB: predicated region body
PF: predicated region fallthrough
CT: control target
= control target key end

     0   :  { %8 = vsyncpa [#allocation4], 0  ;;  %s5412_s0 = inlined_call_operand.vmem [shape: f32[2,18,18,4], index: 0, kind: input, shape index: {}]   ;;  %s5413_s1 = inlined_call_operand.vmem [shape: f32[9,4,128], index: 1, kind: input, shape index: {}]   ;;  %s5414_s2 = inlined_call_operand.vmem [shape: f32[1,128], index: 2, kind: input, shape index: {}]   ;;  %s5415_s3 = inlined_call_operand.hbm [shape: f32[2,8,8,128], index: 3, kind: output, shape index: {}]  }
   0x1   :  { %10 = vsyncpa [#allocation4 + $0x1], 0  ;;  %s4287_s12 = smov 0   ;;  %s4289_s13 = smov 0  }
   0x2   :  { %s4291_s14 = smov 0   ;;  %s4293_s15 = smov 0  }
   0x3 LB: > { %s4308_s16 = sadd.s32 4294967295, %s4263_s15   ;;  %s3644_s17 = sadd.s32 4294967294, %s4263_s15   ;;  %s4263_s15 = sphi %s4293_s15, %s5430_s15   ;;  %s4259_s14 = sphi %s4291_s14, %s5429_s14   ;;  %s4255_s13 = sphi %s4289_s13, %s5428_s13   ;;  %s4251_s12 = sphi %s4287_s12, %s5427_s12  }
   0x4   : > { %s4312_s18 = sadd.s32 1, %s4263_s15   ;;  %s91_s19 = sadd.s32 1, %s4259_s14 }
   0x5   : > { %s88_s20 = ssub.s32 %s4263_s15, %s4312_s18  ;;  %p101_p0 = scmp.ne.s32.totalorder %s4259_s14, %s4255_s13 }
   0x6   : > { %p89_p1 = scmp.eq.s32.totalorder %s88_s20, 0  ;;  %p102_p2 = scmp.eq.s32.totalorder %s4308_s16, 1 }
   0x7   : > { %p107_p3 = scmp.ne.s32.totalorder %s4255_s13, %s4251_s12  ;;  %p108_p4 = scmp.eq.s32.totalorder %s3644_s17, 1 }
   0x8   : > { %s4323_s21 = scalar_select %p89_p1, %s4259_s14, %s91_s19  }
   0x9   : > { %p4325_p5 = por %p102_p2, %p101_p0  ;;  %p4329_p6 = por %p108_p4, %p107_p3 }
   0xa   : > { %p3647_p7 = scmp.ge.s32.totalorder %s4263_s15, 1  ;;  %p140_p8 = scmp.lt.s32.totalorder %s4263_s15, 3 }
   0xc   : > { %p141_p9 = pnand %p3647_p7, %p140_p8 }
   0xe   : > { %144 = sbr.rel (%p141_p9) target bundleno = 825 (0x339), region = 32 }
  0x13   : > { %v201_v0 = vld [vmem:[%s5413_s1] sm:$0xf]  ;;  %vm303_vm0 = vcmask 1043456   ;;  %p164_p10 = scmp.lt.s32.totalorder %s4308_s16, 1  ;;  %v3683_v1 = vld [vmem:[%s5413_s1 + $0x4] sm:$0xf] }
  0x14   : > { %4153 = vmatpush.msk.msra.mxu1 %vm303_vm0, %v201_v0  ;;  %4154 = vmatpush.msk.msra.mxu2 %vm303_vm0, %v201_v0  ;;  %v3717_v2 = vld [vmem:[%s5413_s1 + $0x8] sm:$0xf]  ;;  %v3783_v3 = vld [vmem:[%s5413_s1 + $0xc] sm:$0xf]  ;;  %v3849_v4 = vld [vmem:[%s5413_s1 + $0x10] sm:$0xf] }
  0x15   : > { %s165_s5 = scalar_select %p164_p10, %s4308_s16, 1  ;;  %4155 = vmatpush.msk.msra.mxu3 %vm303_vm0, %v201_v0  ;;  %3650 = vmatpush.msk.msra.mxu0 %vm303_vm0, %v201_v0  ;;  %vm206_vm1 = vcmask 31744   ;;  %v3915_v25 = vld [vmem:[%s5413_s1 + $0x14] sm:$0xf]  ;;  %v3981_v26 = vld [vmem:[%s5413_s1 + $0x18] sm:$0xf] }
  0x16   : > { %3684 = vmatpush.msk.msrb.mxu1 %vm303_vm0, %v3683_v1  ;;  %3718 = vmatpush.msk.msrb.mxu2 %vm303_vm0, %v3717_v2  ;;  %v4047_v31 = vld [vmem:[%s5413_s1 + $0x1c] sm:$0xf]  ;;  %v4113_v40 = vld [vmem:[%s5413_s1 + $0x20] sm:$0xf]  ;;  %s161_s4 = sand.u32 1, %s4255_s13   ;;  %s4152_s6 = sshll.u32 %s4308_s16, 6 }
  0x17   : > { %s4156_s8 = smul.u32 432, %s165_s5  ;;  %3784 = vmatpush.msk.msrb.mxu3 %vm303_vm0, %v3783_v3  ;;  %3850 = vmatpush.msk.msrb.mxu0 %vm303_vm0, %v3849_v4  ;;  %v4570_v63 = vld [vmem:[%s5414_s2] ss:$0 sm:$0xff]  ;;  %s5364_s5 = sshll.u32 %s161_s4, 6 }
  0x18   : > { %s163_s7 = scalar_lea.vmem [#allocation3], %s5364_s5  ;;  %s3578_s10 = scalar_lea.hbm %s5415_s3, %s4152_s6 }
  0x19   : > { %s4363_s11 = scalar_lea.vmem %s5412_s0, %s4156_s8  ;;  %s3579_s16 = sshll.u32 %s163_s7, 4  ;;  %s3580_s16 = int_to_ptr.vmem [resolvable:$true] %s3579_s16 }
  0x1a   : > { %v4366_v5 = vld [vmem:[%s4363_s11 + $0x60] sm:$0xff]  ;;  %v4383_v9 = vld [vmem:[%s4363_s11 + $0x68] sm:$0xff]  ;;  %v4400_v13 = vld [vmem:[%s4363_s11 + $0x78] sm:$0xff]  ;;  %s3567_s17 = scalar_lea.sflag [#allocation4], %s161_s4  ;;  %s4221_s26 = scalar_lea.hbm %s5415_s3, 128 }
  0x1b   : > { %v4369_v6 = vld [vmem:[%s4363_s11 + $0xc0] sm:$0xff]  ;;  %3659 = vmatmul.msk.f32.vlgmr.msra.gmra.mxu1 %vm206_vm1, %v4366_v5  ;;  %v4386_v10 = vld [vmem:[%s4363_s11 + $0xc8] sm:$0xff]  ;;  %v4403_v14 = vld [vmem:[%s4363_s11 + $0xd8] sm:$0xff] }
  0x1c   : > { %3667 = vmatmul.msk.f32.vlgmr.msra.gmra.mxu2 %vm206_vm1, %v4369_v6  ;;  %v4376_v7 = vld [vmem:[%s4363_s11 + $0x120] sm:$0xff]  ;;  %v4389_v11 = vld [vmem:[%s4363_s11 + $0x128] sm:$0xff]  ;;  %v4406_v15 = vld [vmem:[%s4363_s11 + $0x138] sm:$0xff]  ;;  %3916 = vmatpush.msk.msra.mxu1 %vm303_vm0, %v3915_v25 }
  0x1d   : > { %3675 = vmatmul.msk.f32.vlgmr.msra.gmra.mxu3 %vm206_vm1, %v4376_v7  ;;  %v169_v8 = vld [vmem:[%s4363_s11] sm:$0xff]  ;;  %v170_v12 = vld [vmem:[%s4363_s11 + $0x8] sm:$0xff]  ;;  %v171_v16 = vld [vmem:[%s4363_s11 + $0x18] sm:$0xff]  ;;  %3982 = vmatpush.msk.msra.mxu2 %vm303_vm0, %v3981_v26 }
  0x1e   : > { %3651 = vmatmul.msk.f32.vlgmr.msra.gmra.mxu0 %vm206_vm1, %v169_v8  ;;  %v4417_v17 = vld [vmem:[%s4363_s11 + $0x80] sm:$0xff]  ;;  %v4434_v21 = vld [vmem:[%s4363_s11 + $0x90] sm:$0xff]  ;;  %v4456_v27 = vld [vmem:[%s4363_s11 + $0x98] sm:$0xff]  ;;  %4048 = vmatpush.msk.msra.mxu3 %vm303_vm0, %v4047_v31 }
  0x1f   : > { %v4420_v18 = vld [vmem:[%s4363_s11 + $0xe0] sm:$0xff]  ;;  %v4437_v22 = vld [vmem:[%s4363_s11 + $0xf0] sm:$0xff]  ;;  %v4459_v28 = vld [vmem:[%s4363_s11 + $0xf8] sm:$0xff]  ;;  %4114 = vmatpush.msk.msra.mxu0 %vm303_vm0, %v4113_v40 }
  0x20   : > { %v4423_v19 = vld [vmem:[%s4363_s11 + $0x140] sm:$0xff]  ;;  %v197_v23 = vld [vmem:[%s4363_s11 + $0x150] sm:$0xff]  ;;  %v198_v29 = vld [vmem:[%s4363_s11 + $0x158] sm:$0xff] }
  0x21   : > { %v172_v20 = vld [vmem:[%s4363_s11 + $0x20] sm:$0xff]  ;;  %v173_v24 = vld [vmem:[%s4363_s11 + $0x30] sm:$0xff]  ;;  %v174_v30 = vld [vmem:[%s4363_s11 + $0x38] sm:$0xff] }
  0x22   : > { %v4474_v32 = vld [vmem:[%s4363_s11 + $0xa8] sm:$0xff]  ;;  %v4488_v36 = vld [vmem:[%s4363_s11 + $0xb0] sm:$0xff]  ;;  %v454_v43 = vld [vmem:[%s4363_s11 + $0x19] sm:$0xff] }
  0x23   : > { %3660 = vmatmul.msk.f32.gmra.mxu1 %vm206_vm1, %v4383_v9  ;;  %v4477_v33 = vld [vmem:[%s4363_s11 + $0x108] sm:$0xff]  ;;  %v4491_v37 = vld [vmem:[%s4363_s11 + $0x110] sm:$0xff]  ;;  %v796_v47 = vld [vmem:[%s4363_s11 + $0x1a] sm:$0xff] }
  0x24   : > { %3668 = vmatmul.msk.f32.gmra.mxu2 %vm206_vm1, %v4386_v10  ;;  %v199_v34 = vld [vmem:[%s4363_s11 + $0x168] sm:$0xff]  ;;  %v200_v38 = vld [vmem:[%s4363_s11 + $0x170] sm:$0xff]  ;;  %v457_v50 = vld [vmem:[%s4363_s11 + $0x39] sm:$0xff] }
  0x25   : > { %3676 = vmatmul.msk.f32.gmra.mxu3 %vm206_vm1, %v4389_v11  ;;  %v175_v35 = vld [vmem:[%s4363_s11 + $0x48] sm:$0xff]  ;;  %v176_v39 = vld [vmem:[%s4363_s11 + $0x50] sm:$0xff]  ;;  %v799_v53 = vld [vmem:[%s4363_s11 + $0x3a] sm:$0xff] }
  0x26   : > { %3652 = vmatmul.msk.f32.gmra.mxu0 %vm206_vm1, %v170_v12  ;;  %v452_v41 = vld [vmem:[%s4363_s11 + $0x1] sm:$0xff]  ;;  %v453_v44 = vld [vmem:[%s4363_s11 + $0x9] sm:$0xff]  ;;  %v456_v48 = vld [vmem:[%s4363_s11 + $0x31] sm:$0xff] }
  0x27   : > { %v794_v42 = vld [vmem:[%s4363_s11 + $0x2] sm:$0xff]  ;;  %v795_v45 = vld [vmem:[%s4363_s11 + $0xa] sm:$0xff]  ;;  %v798_v51 = vld [vmem:[%s4363_s11 + $0x32] sm:$0xff] }
  0x28   : > { %v455_v46 = vld [vmem:[%s4363_s11 + $0x21] sm:$0xff]  ;;  %v458_v52 = vld [vmem:[%s4363_s11 + $0x49] sm:$0xff]  ;;  %v459_v54 = vld [vmem:[%s4363_s11 + $0x51] sm:$0xff] }
  0x29   : > { %v797_v49 = vld [vmem:[%s4363_s11 + $0x22] sm:$0xff]  ;;  %v800_v55 = vld [vmem:[%s4363_s11 + $0x4a] sm:$0xff]  ;;  %v801_v57 = vld [vmem:[%s4363_s11 + $0x52] sm:$0xff] }
  0x2a   : > { %v460_v56 = vld [vmem:[%s4363_s11 + $0x61] sm:$0xff]  ;;  %v461_v58 = vld [vmem:[%s4363_s11 + $0x69] sm:$0xff]  ;;  %v462_v61 = vld [vmem:[%s4363_s11 + $0x79] sm:$0xff] }
  0x2b   : > { %3661 = vmatmul.msk.f32.gmra.mxu1 %vm206_vm1, %v4400_v13  ;;  %v802_v60 = vld [vmem:[%s4363_s11 + $0x62] sm:$0xff]  ;;  %v803_v4 = vld [vmem:[%s4363_s11 + $0x6a] sm:$0xff] }
  0x2c   : > { %3669 = vmatmul.msk.f32.gmra.mxu2 %vm206_vm1, %v4403_v14  ;;  %v463_v8 = vld [vmem:[%s4363_s11 + $0x81] sm:$0xff] }
  0x2d   : > { %3677 = vmatmul.msk.f32.gmra.mxu3 %vm206_vm1, %v4406_v15 }
  0x2e   : > { %3653 = vmatmul.msk.f32.gmra.mxu0 %vm206_vm1, %v171_v16 }
  0x33   : > { %3662 = vmatmul.msk.f32.gmra.mxu1 %vm206_vm1, %v4417_v17 }
  0x34   : > { %3670 = vmatmul.msk.f32.gmra.mxu2 %vm206_vm1, %v4420_v18 }
  0x35   : > { %3678 = vmatmul.msk.f32.gmra.mxu3 %vm206_vm1, %v4423_v19 }
  0x36   : > { %3654 = vmatmul.msk.f32.gmra.mxu0 %vm206_vm1, %v172_v20 }
  0x3b   : > { %3663 = vmatmul.msk.f32.gmra.mxu1 %vm206_vm1, %v4434_v21 }
  0x3c   : > { %3671 = vmatmul.msk.f32.gmra.mxu2 %vm206_vm1, %v4437_v22 }
  0x3d   : > { %3679 = vmatmul.msk.f32.gmra.mxu3 %vm206_vm1, %v197_v23  ;;  %v804_v23 = vld [vmem:[%s4363_s11 + $0x7a] sm:$0xff] }
  0x3e   : > { %3655 = vmatmul.msk.f32.gmra.mxu0 %vm206_vm1, %v173_v24 }
  0x43   : > { %3664 = vmatmul.msk.f32.gmra.mxu1 %vm206_vm1, %v4456_v27 }
  0x44   : > { %3672 = vmatmul.msk.f32.gmra.mxu2 %vm206_vm1, %v4459_v28 }
  0x45   : > { %3680 = vmatmul.msk.f32.gmra.mxu3 %vm206_vm1, %v198_v29 }
  0x46   : > { %3656 = vmatmul.msk.f32.gmra.mxu0 %vm206_vm1, %v174_v30 }
  0x4b   : > { %3665 = vmatmul.msk.f32.gmra.mxu1 %vm206_vm1, %v4474_v32 }
  0x4c   : > { %3673 = vmatmul.msk.f32.gmra.mxu2 %vm206_vm1, %v4477_v33 }
  0x4d   : > { %3681 = vmatmul.msk.f32.gmra.mxu3 %vm206_vm1, %v199_v34  ;;  %v805_v34 = vld [vmem:[%s4363_s11 + $0x82] sm:$0xff] }
  0x4e   : > { %3657 = vmatmul.msk.f32.gmra.mxu0 %vm206_vm1, %v175_v35 }
  0x53   : > { %3666 = vmatmul.msk.f32.gmra.mxu1 %vm206_vm1, %v4488_v36 }
  0x54   : > { %3674 = vmatmul.msk.f32.gmra.mxu2 %vm206_vm1, %v4491_v37 }
  0x55   : > { %3682 = vmatmul.msk.f32.gmra.mxu3 %vm206_vm1, %v200_v38 }
  0x56   : > { %3658 = vmatmul.msk.f32.gmra.mxu0 %vm206_vm1, %v176_v39 }
  0x5b   : > { %3685 = vmatmul.msk.f32.vlgmr.msrb.gmra.mxu1 %vm206_vm1, %v452_v41 }
  0x5c   : > { %3719 = vmatmul.msk.f32.vlgmr.msrb.gmra.mxu2 %vm206_vm1, %v794_v42 }
  0x5d   : > { %3785 = vmatmul.msk.f32.vlgmr.msrb.gmra.mxu3 %vm206_vm1, %v171_v16 }
  0x5e   : > { %3851 = vmatmul.msk.f32.vlgmr.msrb.gmra.mxu0 %vm206_vm1, %v454_v43 }
  0x63   : > { %3686 = vmatmul.msk.f32.gmra.mxu1 %vm206_vm1, %v453_v44 }
  0x64   : > { %3720 = vmatmul.msk.f32.gmra.mxu2 %vm206_vm1, %v795_v45 }
  0x65   : > { %3786 = vmatmul.msk.f32.gmra.mxu3 %vm206_vm1, %v172_v20 }
  0x66   : > { %3852 = vmatmul.msk.f32.gmra.mxu0 %vm206_vm1, %v455_v46 }
  0x6b   : > { %3687 = vmatmul.msk.f32.gmra.mxu1 %vm206_vm1, %v454_v43  ;;  %v806_v43 = vld [vmem:[%s4363_s11 + $0x92] sm:$0xff] }
  0x6c   : > { %3721 = vmatmul.msk.f32.gmra.mxu2 %vm206_vm1, %v796_v47 }
  0x6d   : > { %3787 = vmatmul.msk.f32.gmra.mxu3 %vm206_vm1, %v173_v24 }
  0x6e   : > { %3853 = vmatmul.msk.f32.gmra.mxu0 %vm206_vm1, %v456_v48 }
  0x73   : > { %3688 = vmatmul.msk.f32.gmra.mxu1 %vm206_vm1, %v455_v46 }
  0x74   : > { %3722 = vmatmul.msk.f32.gmra.mxu2 %vm206_vm1, %v797_v49 }
  0x75   : > { %3788 = vmatmul.msk.f32.gmra.mxu3 %vm206_vm1, %v174_v30 }
  0x76   : > { %3854 = vmatmul.msk.f32.gmra.mxu0 %vm206_vm1, %v457_v50 }
  0x7b   : > { %3689 = vmatmul.msk.f32.gmra.mxu1 %vm206_vm1, %v456_v48 }
  0x7c   : > { %3723 = vmatmul.msk.f32.gmra.mxu2 %vm206_vm1, %v798_v51 }
  0x7d   : > { %3789 = vmatmul.msk.f32.gmra.mxu3 %vm206_vm1, %v175_v35 }
  0x7e   : > { %3855 = vmatmul.msk.f32.gmra.mxu0 %vm206_vm1, %v458_v52 }
  0x83   : > { %3690 = vmatmul.msk.f32.gmra.mxu1 %vm206_vm1, %v457_v50  ;;  %v807_v50 = vld [vmem:[%s4363_s11 + $0x9a] sm:$0xff] }
  0x84   : > { %3724 = vmatmul.msk.f32.gmra.mxu2 %vm206_vm1, %v799_v53 }
  0x85   : > { %3790 = vmatmul.msk.f32.gmra.mxu3 %vm206_vm1, %v176_v39 }
  0x86   : > { %3856 = vmatmul.msk.f32.gmra.mxu0 %vm206_vm1, %v459_v54 }
  0x8b   : > { %3691 = vmatmul.msk.f32.gmra.mxu1 %vm206_vm1, %v458_v52 }
  0x8c   : > { %3725 = vmatmul.msk.f32.gmra.mxu2 %vm206_vm1, %v800_v55 }
  0x8d   : > { %3791 = vmatmul.msk.f32.gmra.mxu3 %vm206_vm1, %v4366_v5 }
  0x8e   : > { %3857 = vmatmul.msk.f32.gmra.mxu0 %vm206_vm1, %v460_v56 }
  0x93   : > { %3692 = vmatmul.msk.f32.gmra.mxu1 %vm206_vm1, %v459_v54 }
  0x94   : > { %3726 = vmatmul.msk.f32.gmra.mxu2 %vm206_vm1, %v801_v57  ;;  %v808_v57 = vld [vmem:[%s4363_s11 + $0xaa] sm:$0xff] }
  0x95   : > { %3792 = vmatmul.msk.f32.gmra.mxu3 %vm206_vm1, %v4383_v9 }
  0x96   : > { %3858 = vmatmul.msk.f32.gmra.mxu0 %vm206_vm1, %v461_v58 }
  0x98   : > { %v4557_v59 = vpop.f32.mrf.mxu1 }
  0x9b   : > { %3693 = vmatmul.msk.f32.gmra.mxu1 %vm206_vm1, %v460_v56  ;;  %v4563_v62 = vpop.f32.mrf.mxu0 }
  0x9c   : > { %3727 = vmatmul.msk.f32.gmra.mxu2 %vm206_vm1, %v802_v60 }
  0x9d   : > { %3793 = vmatmul.msk.f32.gmra.mxu3 %vm206_vm1, %v4400_v13 }
  0x9e   : > { %3859 = vmatmul.msk.f32.gmra.mxu0 %vm206_vm1, %v462_v61 }
  0x9f   : > { %v372_v0 = vpop.f32.mrf.mxu2 }
  0xa0   : > { %v4574_v1 = vadd.f32 %v4570_v63, %v372_v0  ;;  %v396_v2 = vpop.f32.mrf.mxu3  ;;  %v4576_v3 = vpop.f32.mrf.mxu1 }
  0xa1   : > { %v397_v5 = vadd.f32 %v4570_v63, %v396_v2 }
  0xa3   : > { %444 = vst [vmem:[#allocation2 + $0xc0] sm:$0xff] %v397_v5  ;;  %3694 = vmatmul.msk.f32.gmra.mxu1 %vm206_vm1, %v461_v58  ;;  %v4583_v9 = vpop.f32.mrf.mxu0  ;;  %v809_v5 = vld [vmem:[%s4363_s11 + $0xb2] sm:$0xff] }
  0xa4   : > { %3728 = vmatmul.msk.f32.gmra.mxu2 %vm206_vm1, %v803_v4 }
  0xa5   : > { %3794 = vmatmul.msk.f32.gmra.mxu3 %vm206_vm1, %v4417_v17  ;;  %v464_v17 = vld [vmem:[%s4363_s11 + $0x91] sm:$0xff] }
  0xa6   : > { %3860 = vmatmul.msk.f32.gmra.mxu0 %vm206_vm1, %v463_v8 }
  0xa7   : > { %v375_v12 = vpop.f32.mrf.mxu2 }
  0xa8   : > { %v4589_v13 = vadd.f32 %v4570_v63, %v375_v12  ;;  %v399_v16 = vpop.f32.mrf.mxu3  ;;  %v4591_v20 = vpop.f32.mrf.mxu1 }
  0xa9   : > { %v400_v24 = vadd.f32 %v4570_v63, %v399_v16 }
  0xab   : > { %445 = vst [vmem:[#allocation2 + $0xc8] sm:$0xff] %v400_v24  ;;  %3695 = vmatmul.msk.f32.gmra.mxu1 %vm206_vm1, %v462_v61  ;;  %v4598_v25 = vpop.f32.mrf.mxu0 }
  0xac   : > { %3729 = vmatmul.msk.f32.gmra.mxu2 %vm206_vm1, %v804_v23 }
  0xad   : > { %3795 = vmatmul.msk.f32.gmra.mxu3 %vm206_vm1, %v4434_v21  ;;  %v465_v21 = vld [vmem:[%s4363_s11 + $0x99] sm:$0xff] }
  0xae   : > { %3861 = vmatmul.msk.f32.gmra.mxu0 %vm206_vm1, %v464_v17 }
  0xaf   : > { %v378_v26 = vpop.f32.mrf.mxu2 }
  0xb0   : > { %v379_v29 = vadd.f32 %v4570_v63, %v378_v26  ;;  %v402_v30 = vpop.f32.mrf.mxu3  ;;  %v4604_v31 = vpop.f32.mrf.mxu1  ;;  %v810_v26 = vld [vmem:[%s4363_s11 + $0xc2] sm:$0xff] }
  0xb1   : > { %v403_v35 = vadd.f32 %v4570_v63, %v402_v30  ;;  %v325_v30 = vadd.f32 %v4570_v63, %v4563_v62 }
  0xb2   : > { %438 = vst [vmem:[#allocation2 + $0x90] sm:$0xff] %v379_v29 }
  0xb3   : > { %446 = vst [vmem:[#allocation2 + $0xd0] sm:$0xff] %v403_v35  ;;  %3696 = vmatmul.msk.f32.gmra.mxu1 %vm206_vm1, %v463_v8  ;;  %v4611_v38 = vpop.f32.mrf.mxu0 }
  0xb4   : > { %3730 = vmatmul.msk.f32.gmra.mxu2 %vm206_vm1, %v805_v34 }
  0xb5   : > { %3796 = vmatmul.msk.f32.gmra.mxu3 %vm206_vm1, %v4456_v27  ;;  %v466_v27 = vld [vmem:[%s4363_s11 + $0xa9] sm:$0xff] }
  0xb6   : > { %3862 = vmatmul.msk.f32.gmra.mxu0 %vm206_vm1, %v465_v21 }
  0xb7   : > { %v381_v39 = vpop.f32.mrf.mxu2 }
  0xb8   : > { %v382_v40 = vadd.f32 %v4570_v63, %v381_v39  ;;  %v405_v41 = vpop.f32.mrf.mxu3  ;;  %v4617_v42 = vpop.f32.mrf.mxu1 }
  0xb9   : > { %v406_v44 = vadd.f32 %v4570_v63, %v405_v41 }
  0xba   : > { %439 = vst [vmem:[#allocation2 + $0x98] sm:$0xff] %v382_v40 }
  0xbb   : > { %447 = vst [vmem:[#allocation2 + $0xd8] sm:$0xff] %v406_v44  ;;  %3697 = vmatmul.msk.f32.gmra.mxu1 %vm206_vm1, %v464_v17  ;;  %v4624_v45 = vpop.f32.mrf.mxu0  ;;  %v328_v44 = vadd.f32 %v4570_v63, %v4583_v9  ;;  %v812_v9 = vld [vmem:[%s4363_s11 + $0xda] sm:$0xff] }
  0xbc   : > { %3731 = vmatmul.msk.f32.gmra.mxu2 %vm206_vm1, %v806_v43  ;;  %v811_v43 = vld [vmem:[%s4363_s11 + $0xca] sm:$0xff] }
  0xbd   : > { %3797 = vmatmul.msk.f32.gmra.mxu3 %vm206_vm1, %v4474_v32  ;;  %v467_v32 = vld [vmem:[%s4363_s11 + $0xb1] sm:$0xff] }
  0xbe   : > { %3863 = vmatmul.msk.f32.gmra.mxu0 %vm206_vm1, %v466_v27 }
  0xbf   : > { %v384_v46 = vpop.f32.mrf.mxu2 }
  0xc0   : > { %v385_v47 = vadd.f32 %v4570_v63, %v384_v46  ;;  %v408_v48 = vpop.f32.mrf.mxu3  ;;  %v4630_v49 = vpop.f32.mrf.mxu1 }
  0xc1   : > { %v409_v51 = vadd.f32 %v4570_v63, %v408_v48 }
  0xc2   : > { %440 = vst [vmem:[#allocation2 + $0xa0] sm:$0xff] %v385_v47 }
  0xc3   : > { %448 = vst [vmem:[#allocation2 + $0xe0] sm:$0xff] %v409_v51  ;;  %3698 = vmatmul.msk.f32.gmra.mxu1 %vm206_vm1, %v465_v21  ;;  %v4637_v52 = vpop.f32.mrf.mxu0 }
  0xc4   : > { %3732 = vmatmul.msk.f32.gmra.mxu2 %vm206_vm1, %v807_v50 }
  0xc5   : > { %3798 = vmatmul.msk.f32.gmra.mxu3 %vm206_vm1, %v4488_v36  ;;  %v468_v36 = vld [vmem:[%s4363_s11 + $0xc1] sm:$0xff] }
  0xc6   : > { %3864 = vmatmul.msk.f32.gmra.mxu0 %vm206_vm1, %v467_v32 }
  0xc7   : > { %v387_v53 = vpop.f32.mrf.mxu2 }
  0xc8   : > { %v388_v54 = vadd.f32 %v4570_v63, %v387_v53  ;;  %v411_v55 = vpop.f32.mrf.mxu3  ;;  %v4643_v56 = vpop.f32.mrf.mxu1 }
  0xc9   : > { %v412_v58 = vadd.f32 %v4570_v63, %v411_v55  ;;  %v472_v55 = vld [vmem:[%s4363_s11 + $0xf1] sm:$0xff] }
  0xca   : > { %441 = vst [vmem:[#allocation2 + $0xa8] sm:$0xff] %v388_v54  ;;  %v331_v54 = vadd.f32 %v4570_v63, %v4598_v25  ;;  %v813_v25 = vld [vmem:[%s4363_s11 + $0xe2] sm:$0xff] }
  0xcb   : > { %449 = vst [vmem:[#allocation2 + $0xe8] sm:$0xff] %v412_v58  ;;  %3699 = vmatmul.msk.f32.gmra.mxu1 %vm206_vm1, %v466_v27  ;;  %v4650_v60 = vpop.f32.mrf.mxu0  ;;  %v471_v27 = vld [vmem:[%s4363_s11 + $0xe1] sm:$0xff] }
  0xcc   : > { %3733 = vmatmul.msk.f32.gmra.mxu2 %vm206_vm1, %v808_v57 }
  0xcd   : > { %3799 = vmatmul.msk.f32.gmra.mxu3 %vm206_vm1, %v4369_v6  ;;  %v469_v6 = vld [vmem:[%s4363_s11 + $0xc9] sm:$0xff] }
  0xce   : > { %3865 = vmatmul.msk.f32.gmra.mxu0 %vm206_vm1, %v468_v36 }
  0xcf   : > { %v390_v61 = vpop.f32.mrf.mxu2 }
  0xd0   : > { %v391_v0 = vadd.f32 %v4570_v63, %v390_v61  ;;  %v414_v2 = vpop.f32.mrf.mxu3  ;;  %v4656_v4 = vpop.f32.mrf.mxu1 }
  0xd1   : > { %v415_v8 = vadd.f32 %v4570_v63, %v414_v2 }
  0xd2   : > { %442 = vst [vmem:[#allocation2 + $0xb0] sm:$0xff] %v391_v0 }
  0xd3   : > { %450 = vst [vmem:[#allocation2 + $0xf0] sm:$0xff] %v415_v8  ;;  %3700 = vmatmul.msk.f32.gmra.mxu1 %vm206_vm1, %v467_v32  ;;  %v4663_v12 = vpop.f32.mrf.mxu0  ;;  %v334_v8 = vadd.f32 %v4570_v63, %v4611_v38  ;;  %v814_v38 = vld [vmem:[%s4363_s11 + $0xf2] sm:$0xff] }
  0xd4   : > { %3734 = vmatmul.msk.f32.gmra.mxu2 %vm206_vm1, %v809_v5 }
  0xd5   : > { %3800 = vmatmul.msk.f32.gmra.mxu3 %vm206_vm1, %v4386_v10  ;;  %v470_v10 = vld [vmem:[%s4363_s11 + $0xd9] sm:$0xff] }
  0xd6   : > { %3866 = vmatmul.msk.f32.gmra.mxu0 %vm206_vm1, %v469_v6 }
  0xd7   : > { %v393_v16 = vpop.f32.mrf.mxu2 }
  0xd8   : > { %v394_v23 = vadd.f32 %v4570_v63, %v393_v16  ;;  %v417_v24 = vpop.f32.mrf.mxu3  ;;  %v602_v17 = vpop.f32.mrf.mxu1 }
  0xd9   : > { %v418_v29 = vadd.f32 %v4570_v63, %v417_v24  ;;  %v730_v35 = vadd.f32 %v602_v17, %v325_v30 }
  0xda   : > { %443 = vst [vmem:[#allocation2 + $0xb8] sm:$0xff] %v394_v23 }
  0xdb   : > { %451 = vst [vmem:[#allocation2 + $0xf8] sm:$0xff] %v418_v29  ;;  %3701 = vmatmul.msk.f32.gmra.mxu1 %vm206_vm1, %v468_v36  ;;  %v1629_v34 = vpop.f32.mrf.mxu0 }
  0xdc   : > { %3735 = vmatmul.msk.f32.gmra.mxu2 %vm206_vm1, %v810_v26 }
  0xdd   : > { %3801 = vmatmul.msk.f32.gmra.mxu3 %vm206_vm1, %v4403_v14 }
  0xde   : > { %3867 = vmatmul.msk.f32.gmra.mxu0 %vm206_vm1, %v470_v10 }
  0xdf   : > { %v944_v21 = vpop.f32.mrf.mxu2 }
  0xe0   : > { %v1072_v39 = vadd.f32 %v944_v21, %v730_v35  ;;  %v1287_v40 = vpop.f32.mrf.mxu3  ;;  %v605_v41 = vpop.f32.mrf.mxu1 }
  0xe1   : > { %v731_v47 = vadd.f32 %v605_v41, %v328_v44  ;;  %v340_v44 = vadd.f32 %v4570_v63, %v4637_v52  ;;  %v816_v52 = vld [vmem:[%s4363_s11 + $0x10a] sm:$0xff] }
  0xe2   : > { %v1415_v62 = vadd.f32 %v1287_v40, %v1072_v39 }
  0xe3   : > { %3702 = vmatmul.msk.f32.gmra.mxu1 %vm206_vm1, %v469_v6  ;;  %v1632_v46 = vpop.f32.mrf.mxu0  ;;  %v473_v6 = vld [vmem:[%s4363_s11 + $0xf9] sm:$0xff] }
  0xe4   : > { %3736 = vmatmul.msk.f32.gmra.mxu2 %vm206_vm1, %v811_v43  ;;  %v1757_v14 = vadd.f32 %v1629_v34, %v1415_v62  ;;  %v474_v34 = vld [vmem:[%s4363_s11 + $0x109] sm:$0xff] }
  0xe5   : > { %3802 = vmatmul.msk.f32.gmra.mxu3 %vm206_vm1, %v4420_v18 }
  0xe6   : > { %1789 = vst [vmem:[#allocation2] sm:$0xff] %v1757_v14  ;;  %3868 = vmatmul.msk.f32.gmra.mxu0 %vm206_vm1, %v471_v27 }
  0xe7   : > { %v947_v48 = vpop.f32.mrf.mxu2 }
  0xe8   : > { %v1073_v50 = vadd.f32 %v947_v48, %v731_v47  ;;  %v1290_v51 = vpop.f32.mrf.mxu3  ;;  %v608_v32 = vpop.f32.mrf.mxu1 }
  0xe9   : > { %v732_v58 = vadd.f32 %v608_v32, %v331_v54 }
  0xea   : > { %v1416_v53 = vadd.f32 %v1290_v51, %v1073_v50 }
  0xeb   : > { %3703 = vmatmul.msk.f32.gmra.mxu1 %vm206_vm1, %v470_v10  ;;  %v1635_v57 = vpop.f32.mrf.mxu0  ;;  %v337_v10 = vadd.f32 %v4570_v63, %v4624_v45  ;;  %v815_v45 = vld [vmem:[%s4363_s11 + $0xfa] sm:$0xff] }
  0xec   : > { %3737 = vmatmul.msk.f32.gmra.mxu2 %vm206_vm1, %v812_v9  ;;  %v1758_v18 = vadd.f32 %v1632_v46, %v1416_v53  ;;  %v343_v9 = vadd.f32 %v4570_v63, %v4650_v60  ;;  %v476_v53 = vld [vmem:[%s4363_s11 + $0x121] sm:$0xff]  ;;  %v817_v60 = vld [vmem:[%s4363_s11 + $0x112] sm:$0xff] }
  0xed   : > { %3803 = vmatmul.msk.f32.gmra.mxu3 %vm206_vm1, %v4437_v22 }
  0xee   : > { %1790 = vst [vmem:[#allocation2 + $0x8] sm:$0xff] %v1758_v18  ;;  %3869 = vmatmul.msk.f32.gmra.mxu0 %vm206_vm1, %v472_v55 }
  0xef   : > { %v950_v36 = vpop.f32.mrf.mxu2 }
  0xf0   : > { %v1074_v61 = vadd.f32 %v950_v36, %v732_v58  ;;  %v1293_v0 = vpop.f32.mrf.mxu3  ;;  %v611_v2 = vpop.f32.mrf.mxu1 }
  0xf1   : > { %v733_v23 = vadd.f32 %v611_v2, %v334_v8  ;;  %v477_v2 = vld [vmem:[%s4363_s11 + $0x129] sm:$0xff] }
  0xf2   : > { %v1417_v5 = vadd.f32 %v1293_v0, %v1074_v61  ;;  %v346_v0 = vadd.f32 %v4570_v63, %v4663_v12  ;;  %v818_v12 = vld [vmem:[%s4363_s11 + $0x122] sm:$0xff] }
  0xf3   : > { %3704 = vmatmul.msk.f32.gmra.mxu1 %vm206_vm1, %v471_v27  ;;  %v1638_v16 = vpop.f32.mrf.mxu0  ;;  %v475_v27 = vld [vmem:[%s4363_s11 + $0x111] sm:$0xff] }
  0xf4   : > { %3738 = vmatmul.msk.f32.gmra.mxu2 %vm206_vm1, %v813_v25  ;;  %v1759_v22 = vadd.f32 %v1635_v57, %v1417_v5 }
  0xf5   : > { %3804 = vmatmul.msk.f32.gmra.mxu3 %vm206_vm1, %v4459_v28 }
  0xf6   : > { %1791 = vst [vmem:[#allocation2 + $0x10] sm:$0xff] %v1759_v22  ;;  %3870 = vmatmul.msk.f32.gmra.mxu0 %vm206_vm1, %v473_v6 }
  0xf7   : > { %v953_v24 = vpop.f32.mrf.mxu2 }
  0xf8   : > { %v1075_v17 = vadd.f32 %v953_v24, %v733_v23  ;;  %v1296_v26 = vpop.f32.mrf.mxu3  ;;  %v614_v29 = vpop.f32.mrf.mxu1  ;;  %v349_v24 = vadd.f32 %v4570_v63, %v4557_v59  ;;  %v819_v59 = vld [vmem:[%s4363_s11 + $0x12a] sm:$0xff] }
  0xf9   : > { %v734_v21 = vadd.f32 %v614_v29, %v337_v10 }
  0xfa   : > { %v1418_v30 = vadd.f32 %v1296_v26, %v1075_v17  ;;  %v478_v17 = vld [vmem:[%s4363_s11 + $0x139] sm:$0xff] }
  0xfb   : > { %3705 = vmatmul.msk.f32.gmra.mxu1 %vm206_vm1, %v472_v55  ;;  %v1641_v35 = vpop.f32.mrf.mxu0 }
  0xfc   : > { %3739 = vmatmul.msk.f32.gmra.mxu2 %vm206_vm1, %v814_v38  ;;  %v1760_v28 = vadd.f32 %v1638_v16, %v1418_v30 }
  0xfd   : > { %3805 = vmatmul.msk.f32.gmra.mxu3 %vm206_vm1, %v4477_v33 }
  0xfe   : > { %1792 = vst [vmem:[#allocation2 + $0x18] sm:$0xff] %v1760_v28  ;;  %3871 = vmatmul.msk.f32.gmra.mxu0 %vm206_vm1, %v474_v34 }
  0xff   : > { %v956_v39 = vpop.f32.mrf.mxu2 }
 0x100   : > { %v1076_v40 = vadd.f32 %v956_v39, %v734_v21  ;;  %v1299_v41 = vpop.f32.mrf.mxu3  ;;  %v617_v43 = vpop.f32.mrf.mxu1 }
 0x101   : > { %v735_v46 = vadd.f32 %v617_v43, %v340_v44 }
 0x102   : > { %v1419_v62 = vadd.f32 %v1299_v41, %v1076_v40 }
 0x103   : > { %3706 = vmatmul.msk.f32.gmra.mxu1 %vm206_vm1, %v473_v6  ;;  %v1644_v14 = vpop.f32.mrf.mxu0 }
 0x104   : > { %3740 = vmatmul.msk.f32.gmra.mxu2 %vm206_vm1, %v815_v45  ;;  %v1761_v33 = vadd.f32 %v1641_v35, %v1419_v62  ;;  %v352_v35 = vadd.f32 %v4570_v63, %v4576_v3  ;;  %v820_v62 = vld [vmem:[%s4363_s11 + $0x13a] sm:$0xff] }
 0x105   : > { %3806 = vmatmul.msk.f32.gmra.mxu3 %vm206_vm1, %v4491_v37 }
 0x106   : > { %1793 = vst [vmem:[#allocation2 + $0x20] sm:$0xff] %v1761_v33  ;;  %3872 = vmatmul.msk.f32.gmra.mxu0 %vm206_vm1, %v475_v27  ;;  %v355_v33 = vadd.f32 %v4570_v63, %v4591_v20  ;;  %v821_v20 = vld [vmem:[%s4363_s11 + $0x142] sm:$0xff] }
 0x107   : > { %v959_v47 = vpop.f32.mrf.mxu2 }
 0x108   : > { %v1077_v48 = vadd.f32 %v959_v47, %v735_v46  ;;  %v1302_v50 = vpop.f32.mrf.mxu3  ;;  %v620_v51 = vpop.f32.mrf.mxu1 }
 0x109   : > { %v736_v55 = vadd.f32 %v620_v51, %v343_v9  ;;  %v3778_v9 = vld [vmem:[%s4363_s11 + $0x158] sm:$0xff] }
 0x10a   : > { %v1420_v32 = vadd.f32 %v1302_v50, %v1077_v48 }
 0x10b   : > { %3707 = vmatmul.msk.f32.gmra.mxu1 %vm206_vm1, %v474_v34  ;;  %v1647_v54 = vpop.f32.mrf.mxu0 }
 0x10c   : > { %3741 = vmatmul.msk.f32.gmra.mxu2 %vm206_vm1, %v816_v52  ;;  %v1762_v37 = vadd.f32 %v1644_v14, %v1420_v32 }
 0x10d   : > { %3807 = vmatmul.msk.f32.gmra.mxu3 %vm206_vm1, %v4376_v7 }
 0x10e   : > { %1794 = vst [vmem:[#allocation2 + $0x28] sm:$0xff] %v1762_v37  ;;  %3873 = vmatmul.msk.f32.gmra.mxu0 %vm206_vm1, %v476_v53  ;;  %v481_v37 = vld [vmem:[%s4363_s11 + $0x159] sm:$0xff] }
 0x10f   : > { %v962_v18 = vpop.f32.mrf.mxu2 }
 0x110   : > { %v1078_v57 = vadd.f32 %v962_v18, %v736_v55  ;;  %v1305_v58 = vpop.f32.mrf.mxu3  ;;  %v623_v36 = vpop.f32.mrf.mxu1 }
 0x111   : > { %v737_v5 = vadd.f32 %v623_v36, %v346_v0  ;;  %v3779_v0 = vld [vmem:[%s4363_s11 + $0x168] sm:$0xff] }
 0x112   : > { %v1421_v61 = vadd.f32 %v1305_v58, %v1078_v57 }
 0x113   : > { %3708 = vmatmul.msk.f32.gmra.mxu1 %vm206_vm1, %v475_v27  ;;  %v1650_v25 = vpop.f32.mrf.mxu0  ;;  %v3777_v27 = vld [vmem:[%s4363_s11 + $0x150] sm:$0xff] }
 0x114   : > { %3742 = vmatmul.msk.f32.gmra.mxu2 %vm206_vm1, %v817_v60  ;;  %v1763_v7 = vadd.f32 %v1647_v54, %v1421_v61 }
 0x115   : > { %3808 = vmatmul.msk.f32.gmra.mxu3 %vm206_vm1, %v4389_v11 }
 0x116   : > { %1795 = vst [vmem:[#allocation2 + $0x30] sm:$0xff] %v1763_v7  ;;  %3874 = vmatmul.msk.f32.gmra.mxu0 %vm206_vm1, %v477_v2  ;;  %v482_v7 = vld [vmem:[%s4363_s11 + $0x169] sm:$0xff] }
 0x117   : > { %v965_v8 = vpop.f32.mrf.mxu2 }
 0x118   : > { %v1079_v6 = vadd.f32 %v965_v8, %v737_v5  ;;  %v1308_v22 = vpop.f32.mrf.mxu3  ;;  %v626_v16 = vpop.f32.mrf.mxu1 }
 0x119   : > { %v738_v29 = vadd.f32 %v626_v16, %v349_v24  ;;  %v3780_v24 = vld [vmem:[%s4363_s11 + $0x170] sm:$0xff] }
 0x11a   : > { %v1422_v23 = vadd.f32 %v1308_v22, %v1079_v6 }
 0x11b   : > { %3709 = vmatmul.msk.f32.gmra.mxu1 %vm206_vm1, %v476_v53  ;;  %v1653_v26 = vpop.f32.mrf.mxu0  ;;  %v358_v53 = vadd.f32 %v4570_v63, %v4604_v31  ;;  %v822_v31 = vld [vmem:[%s4363_s11 + $0x152] sm:$0xff] }
 0x11c   : > { %3743 = vmatmul.msk.f32.gmra.mxu2 %vm206_vm1, %v818_v12  ;;  %v1764_v11 = vadd.f32 %v1650_v25, %v1422_v23 }
 0x11d   : > { %3809 = vmatmul.msk.f32.gmra.mxu3 %vm206_vm1, %v4406_v15  ;;  %v479_v15 = vld [vmem:[%s4363_s11 + $0x141] sm:$0xff] }
 0x11e   : > { %1796 = vst [vmem:[#allocation2 + $0x38] sm:$0xff] %v1764_v11  ;;  %3875 = vmatmul.msk.f32.gmra.mxu0 %vm206_vm1, %v478_v17  ;;  %v483_v11 = vld [vmem:[%s4363_s11 + $0x171] sm:$0xff] }
 0x11f   : > { %v968_v38 = vpop.f32.mrf.mxu2 }
 0x120   : > { %v1080_v30 = vadd.f32 %v968_v38, %v738_v29  ;;  %v1311_v10 = vpop.f32.mrf.mxu3  ;;  %v629_v34 = vpop.f32.mrf.mxu1 }
 0x121   : > { %v739_v40 = vadd.f32 %v629_v34, %v352_v35  ;;  %v3781_v35 = vld [vmem:[%s4363_s11 + $0x180] sm:$0xff] }
 0x122   : > { %v1423_v28 = vadd.f32 %v1311_v10, %v1080_v30 }
 0x123   : > { %3710 = vmatmul.msk.f32.gmra.mxu1 %vm206_vm1, %v477_v2  ;;  %v1656_v39 = vpop.f32.mrf.mxu0  ;;  %v361_v2 = vadd.f32 %v4570_v63, %v4617_v42  ;;  %v823_v42 = vld [vmem:[%s4363_s11 + $0x15a] sm:$0xff] }
 0x124   : > { %3744 = vmatmul.msk.f32.gmra.mxu2 %vm206_vm1, %v819_v59  ;;  %v1765_v21 = vadd.f32 %v1653_v26, %v1423_v28 }
 0x125   : > { %3810 = vmatmul.msk.f32.gmra.mxu3 %vm206_vm1, %v4423_v19  ;;  %v480_v19 = vld [vmem:[%s4363_s11 + $0x151] sm:$0xff] }
 0x126   : > { %1797 = vst [vmem:[#allocation2 + $0x40] sm:$0xff] %v1765_v21  ;;  %3876 = vmatmul.msk.f32.gmra.mxu0 %vm206_vm1, %v479_v15 }
 0x127   : > { %v971_v41 = vpop.f32.mrf.mxu2 }
 0x128   : > { %v1081_v43 = vadd.f32 %v971_v41, %v739_v40  ;;  %v1314_v45 = vpop.f32.mrf.mxu3  ;;  %v632_v3 = vpop.f32.mrf.mxu1  ;;  %v3847_v40 = vld [vmem:[%s4363_s11 + $0x181] sm:$0xff] }
 0x129   : > { %v740_v47 = vadd.f32 %v632_v3, %v355_v33  ;;  %v370_v33 = vadd.f32 %v4570_v63, %v4656_v4  ;;  %v3949_v4 = vld [vmem:[%s4363_s11 + $0x30] sm:$0xff] }
 0x12a   : > { %v1424_v44 = vadd.f32 %v1314_v45, %v1081_v43 }
 0x12b   : > { %3711 = vmatmul.msk.f32.gmra.mxu1 %vm206_vm1, %v478_v17  ;;  %v1659_v46 = vpop.f32.mrf.mxu0  ;;  %v364_v17 = vadd.f32 %v4570_v63, %v4630_v49  ;;  %v824_v49 = vld [vmem:[%s4363_s11 + $0x16a] sm:$0xff] }
 0x12c   : > { %3745 = vmatmul.msk.f32.gmra.mxu2 %vm206_vm1, %v820_v62  ;;  %v1766_v14 = vadd.f32 %v1656_v39, %v1424_v44 }
 0x12d   : > { %3811 = vmatmul.msk.f32.gmra.mxu3 %vm206_vm1, %v3777_v27  ;;  %v3782_v27 = vld [vmem:[%s4363_s11 + $0x188] sm:$0xff] }
 0x12e   : > { %1798 = vst [vmem:[#allocation2 + $0x48] sm:$0xff] %v1766_v14  ;;  %3877 = vmatmul.msk.f32.gmra.mxu0 %vm206_vm1, %v480_v19 }
 0x12f   : > { %v974_v48 = vpop.f32.mrf.mxu2 }
 0x130   : > { %v1082_v50 = vadd.f32 %v974_v48, %v740_v47  ;;  %v1317_v51 = vpop.f32.mrf.mxu3  ;;  %v635_v52 = vpop.f32.mrf.mxu1 }
 0x131   : > { %v741_v18 = vadd.f32 %v635_v52, %v358_v53 }
 0x132   : > { %v1425_v32 = vadd.f32 %v1317_v51, %v1082_v50 }
 0x133   : > { %3712 = vmatmul.msk.f32.gmra.mxu1 %vm206_vm1, %v479_v15  ;;  %v1662_v55 = vpop.f32.mrf.mxu0  ;;  %v367_v15 = vadd.f32 %v4570_v63, %v4643_v56  ;;  %v825_v56 = vld [vmem:[%s4363_s11 + $0x172] sm:$0xff]  ;;  %v3883_v63 = vld [vmem:[%s4363_s11 + $0x1a] sm:$0xff] }
 0x134   : > { %3746 = vmatmul.msk.f32.gmra.mxu2 %vm206_vm1, %v821_v20  ;;  %v1767_v54 = vadd.f32 %v1659_v46, %v1425_v32  ;;  %v3848_v46 = vld [vmem:[%s4363_s11 + $0x189] sm:$0xff]  ;;  %v4015_v32 = vld [vmem:[%s4363_s11 + $0x31] sm:$0xff] }
 0x135   : > { %3812 = vmatmul.msk.f32.gmra.mxu3 %vm206_vm1, %v3778_v9  ;;  %v3885_v9 = vld [vmem:[%s4363_s11 + $0x32] sm:$0xff] }
 0x136   : > { %1799 = vst [vmem:[#allocation2 + $0x50] sm:$0xff] %v1767_v54  ;;  %3878 = vmatmul.msk.f32.gmra.mxu0 %vm206_vm1, %v481_v37 }
 0x137   : > { %v977_v57 = vpop.f32.mrf.mxu2 }
 0x138   : > { %v1083_v58 = vadd.f32 %v977_v57, %v741_v18  ;;  %v1320_v36 = vpop.f32.mrf.mxu3  ;;  %v638_v60 = vpop.f32.mrf.mxu1 }
 0x139   : > { %v742_v8 = vadd.f32 %v638_v60, %v361_v2  ;;  %v3950_v60 = vld [vmem:[%s4363_s11 + $0x38] sm:$0xff] }
 0x13a   : > { %v1426_v61 = vadd.f32 %v1320_v36, %v1083_v58  ;;  %v3884_v36 = vld [vmem:[%s4363_s11 + $0x22] sm:$0xff] }
 0x13b   : > { %3713 = vmatmul.msk.f32.gmra.mxu1 %vm206_vm1, %v480_v19  ;;  %v1665_v5 = vpop.f32.mrf.mxu0 }
 0x13c   : > { %3747 = vmatmul.msk.f32.gmra.mxu2 %vm206_vm1, %v822_v31  ;;  %v1768_v25 = vadd.f32 %v1662_v55, %v1426_v61  ;;  %v4016_v61 = vld [vmem:[%s4363_s11 + $0x39] sm:$0xff] }
 0x13d   : > { %3813 = vmatmul.msk.f32.gmra.mxu3 %vm206_vm1, %v3779_v0  ;;  %v3886_v0 = vld [vmem:[%s4363_s11 + $0x3a] sm:$0xff] }
 0x13e   : > { %1800 = vst [vmem:[#allocation2 + $0x58] sm:$0xff] %v1768_v25  ;;  %3879 = vmatmul.msk.f32.gmra.mxu0 %vm206_vm1, %v482_v7 }
 0x13f   : > { %v980_v6 = vpop.f32.mrf.mxu2 }
 0x140   : > { %v1084_v22 = vadd.f32 %v980_v6, %v742_v8  ;;  %v1323_v16 = vpop.f32.mrf.mxu3  ;;  %v641_v12 = vpop.f32.mrf.mxu1 }
 0x141   : > { %v743_v38 = vadd.f32 %v641_v12, %v364_v17  ;;  %v4017_v12 = vld [vmem:[%s4363_s11 + $0x49] sm:$0xff] }
 0x142   : > { %v1427_v23 = vadd.f32 %v1323_v16, %v1084_v22  ;;  %v3951_v22 = vld [vmem:[%s4363_s11 + $0x48] sm:$0xff] }
 0x143   : > { %3714 = vmatmul.msk.f32.gmra.mxu1 %vm206_vm1, %v481_v37  ;;  %v1668_v29 = vpop.f32.mrf.mxu0 }
 0x144   : > { %3748 = vmatmul.msk.f32.gmra.mxu2 %vm206_vm1, %v823_v42  ;;  %v1769_v26 = vadd.f32 %v1665_v5, %v1427_v23  ;;  %v3887_v42 = vld [vmem:[%s4363_s11 + $0x4a] sm:$0xff] }
 0x145   : > { %3814 = vmatmul.msk.f32.gmra.mxu3 %vm206_vm1, %v3780_v24  ;;  %v716_v24 = vld [vmem:[#allocation2 + $0x90] sm:$0xff] }
 0x146   : > { %1801 = vst [vmem:[#allocation2 + $0x60] sm:$0xff] %v1769_v26  ;;  %3880 = vmatmul.msk.f32.gmra.mxu0 %vm206_vm1, %v483_v11 }
 0x147   : > { %v983_v30 = vpop.f32.mrf.mxu2 }
 0x148   : > { %v1085_v10 = vadd.f32 %v983_v30, %v743_v38  ;;  %v1326_v34 = vpop.f32.mrf.mxu3  ;;  %v644_v59 = vpop.f32.mrf.mxu1  ;;  %v3952_v30 = vld [vmem:[%s4363_s11 + $0x50] sm:$0xff] }
 0x149   : > { %v744_v41 = vadd.f32 %v644_v59, %v367_v15  ;;  %v3888_v59 = vld [vmem:[%s4363_s11 + $0x52] sm:$0xff] }
 0x14a   : > { %v1428_v28 = vadd.f32 %v1326_v34, %v1085_v10  ;;  %v4018_v34 = vld [vmem:[%s4363_s11 + $0x51] sm:$0xff] }
 0x14b   : > { %3715 = vmatmul.msk.f32.gmra.mxu1 %vm206_vm1, %v482_v7  ;;  %v1671_v39 = vpop.f32.mrf.mxu0 }
 0x14c   : > { %3749 = vmatmul.msk.f32.gmra.mxu2 %vm206_vm1, %v824_v49  ;;  %v1770_v21 = vadd.f32 %v1668_v29, %v1428_v28 }
 0x14d   : > { %3815 = vmatmul.msk.f32.gmra.mxu3 %vm206_vm1, %v3781_v35  ;;  %v717_v35 = vld [vmem:[#allocation2 + $0x98] sm:$0xff] }
 0x14e   : > { %1802 = vst [vmem:[#allocation2 + $0x68] sm:$0xff] %v1770_v21  ;;  %3881 = vmatmul.msk.f32.gmra.mxu0 %vm206_vm1, %v3847_v40 }
 0x14f   : > { %v986_v43 = vpop.f32.mrf.mxu2 }
 0x150   : > { %v1086_v45 = vadd.f32 %v986_v43, %v744_v41  ;;  %v1329_v3 = vpop.f32.mrf.mxu3  ;;  %v647_v62 = vpop.f32.mrf.mxu1  ;;  %v3953_v43 = vld [vmem:[%s4363_s11 + $0x60] sm:$0xff] }
 0x151   : > { %v745_v47 = vadd.f32 %v647_v62, %v370_v33  ;;  %v3889_v62 = vld [vmem:[%s4363_s11 + $0x62] sm:$0xff] }
 0x152   : > { %v1429_v44 = vadd.f32 %v1329_v3, %v1086_v45  ;;  %v4019_v3 = vld [vmem:[%s4363_s11 + $0x61] sm:$0xff] }
 0x153   : > { %3716 = vmatmul.msk.f32.gmra.mxu1 %vm206_vm1, %v483_v11  ;;  %v1674_v14 = vpop.f32.mrf.mxu0 }
 0x154   : > { %3750 = vmatmul.msk.f32.gmra.mxu2 %vm206_vm1, %v825_v56  ;;  %v1771_v19 = vadd.f32 %v1671_v39, %v1429_v44 }
 0x155   : > { %3816 = vmatmul.msk.f32.gmra.mxu3 %vm206_vm1, %v3782_v27  ;;  %v718_v27 = vld [vmem:[#allocation2 + $0xa0] sm:$0xff] }
 0x156   : > { %1803 = vst [vmem:[#allocation2 + $0x70] sm:$0xff] %v1771_v19  ;;  %3882 = vmatmul.msk.f32.gmra.mxu0 %vm206_vm1, %v3848_v46 }
 0x157   : > { %v989_v48 = vpop.f32.mrf.mxu2 }
 0x158   : > { %v1087_v50 = vadd.f32 %v989_v48, %v745_v47  ;;  %v1332_v51 = vpop.f32.mrf.mxu3  ;;  %v650_v52 = vpop.f32.mrf.mxu1  ;;  %v3954_v48 = vld [vmem:[%s4363_s11 + $0x68] sm:$0xff] }
 0x159   : > { %v746_v54 = vadd.f32 %v650_v52, %v4574_v1  ;;  %v3890_v52 = vld [vmem:[%s4363_s11 + $0x6a] sm:$0xff] }
 0x15a   : > { %v1430_v20 = vadd.f32 %v1332_v51, %v1087_v50  ;;  %v4020_v51 = vld [vmem:[%s4363_s11 + $0x69] sm:$0xff] }
 0x15b   : > { %3917 = vmatmul.msk.f32.vlgmr.msra.gmra.mxu1 %vm206_vm1, %v3883_v63  ;;  %v1677_v37 = vpop.f32.mrf.mxu0 }
 0x15c   : > { %3983 = vmatmul.msk.f32.vlgmr.msra.gmra.mxu2 %vm206_vm1, %v3949_v4  ;;  %v1772_v53 = vadd.f32 %v1674_v14, %v1430_v20  ;;  %v719_v20 = vld [vmem:[#allocation2 + $0xa8] sm:$0xff] }
 0x15d   : > { %4049 = vmatmul.msk.f32.vlgmr.msra.gmra.mxu3 %vm206_vm1, %v4015_v32 }
 0x15e   : > { %1804 = vst [vmem:[#allocation2 + $0x78] sm:$0xff] %v1772_v53  ;;  %4115 = vmatmul.msk.f32.vlgmr.msra.gmra.mxu0 %vm206_vm1, %v3885_v9 }
 0x15f   : > { %v992_v55 = vpop.f32.mrf.mxu2 }
 0x160   : > { %v1088_v18 = vadd.f32 %v992_v55, %v746_v54  ;;  %v1335_v57 = vpop.f32.mrf.mxu3  ;;  %v653_v58 = vpop.f32.mrf.mxu1  ;;  %v3955_v55 = vld [vmem:[%s4363_s11 + $0x78] sm:$0xff] }
 0x161   : > { %v747_v7 = vadd.f32 %v653_v58, %v4589_v13  ;;  %v3891_v58 = vld [vmem:[%s4363_s11 + $0x7a] sm:$0xff] }
 0x162   : > { %v1431_v31 = vadd.f32 %v1335_v57, %v1088_v18  ;;  %v4021_v57 = vld [vmem:[%s4363_s11 + $0x79] sm:$0xff] }
 0x163   : > { %3918 = vmatmul.msk.f32.gmra.mxu1 %vm206_vm1, %v3884_v36  ;;  %v1680_v2 = vpop.f32.mrf.mxu0 }
 0x164   : > { %3984 = vmatmul.msk.f32.gmra.mxu2 %vm206_vm1, %v3950_v60  ;;  %v1773_v1 = vadd.f32 %v1677_v37, %v1431_v31  ;;  %v720_v31 = vld [vmem:[#allocation2 + $0xb0] sm:$0xff] }
 0x165   : > { %4050 = vmatmul.msk.f32.gmra.mxu3 %vm206_vm1, %v4016_v61 }
 0x166   : > { %1805 = vst [vmem:[#allocation2 + $0x80] sm:$0xff] %v1773_v1  ;;  %4116 = vmatmul.msk.f32.gmra.mxu0 %vm206_vm1, %v3886_v0 }
 0x167   : > { %v995_v25 = vpop.f32.mrf.mxu2 }
 0x168   : > { %v1089_v5 = vadd.f32 %v995_v25, %v747_v7  ;;  %v1338_v8 = vpop.f32.mrf.mxu3  ;;  %v656_v6 = vpop.f32.mrf.mxu1  ;;  %v3956_v25 = vld [vmem:[%s4363_s11 + $0x80] sm:$0xff] }
 0x169   : > { %v748_v17 = vadd.f32 %v716_v24, %v656_v6  ;;  %v3892_v6 = vld [vmem:[%s4363_s11 + $0x82] sm:$0xff] }
 0x16a   : > { %v1432_v16 = vadd.f32 %v1338_v8, %v1089_v5  ;;  %v4022_v8 = vld [vmem:[%s4363_s11 + $0x81] sm:$0xff] }
 0x16b   : > { %3919 = vmatmul.msk.f32.gmra.mxu1 %vm206_vm1, %v3885_v9  ;;  %v1683_v13 = vpop.f32.mrf.mxu0 }
 0x16c   : > { %3985 = vmatmul.msk.f32.gmra.mxu2 %vm206_vm1, %v3951_v22  ;;  %v1774_v23 = vadd.f32 %v1680_v2, %v1432_v16 }
 0x16d   : > { %4051 = vmatmul.msk.f32.gmra.mxu3 %vm206_vm1, %v4017_v12  ;;  %v721_v12 = vld [vmem:[#allocation2 + $0xb8] sm:$0xff] }
 0x16e   : > { %1806 = vst [vmem:[#allocation2 + $0x88] sm:$0xff] %v1774_v23  ;;  %4117 = vmatmul.msk.f32.gmra.mxu0 %vm206_vm1, %v3887_v42 }
 0x16f   : > { %v998_v11 = vpop.f32.mrf.mxu2 }
 0x170   : > { %v1090_v26 = vadd.f32 %v998_v11, %v748_v17  ;;  %v1341_v29 = vpop.f32.mrf.mxu3  ;;  %v659_v38 = vpop.f32.mrf.mxu1  ;;  %v3957_v11 = vld [vmem:[%s4363_s11 + $0x90] sm:$0xff] }
 0x171   : > { %v749_v15 = vadd.f32 %v717_v35, %v659_v38  ;;  %v3893_v38 = vld [vmem:[%s4363_s11 + $0x92] sm:$0xff] }
 0x172   : > { %v1433_v10 = vadd.f32 %v1341_v29, %v1090_v26  ;;  %v4023_v29 = vld [vmem:[%s4363_s11 + $0x91] sm:$0xff] }
 0x173   : > { %3920 = vmatmul.msk.f32.gmra.mxu1 %vm206_vm1, %v3886_v0  ;;  %v1686_v28 = vpop.f32.mrf.mxu0 }
 0x174   : > { %3986 = vmatmul.msk.f32.gmra.mxu2 %vm206_vm1, %v3952_v30  ;;  %v1775_v49 = vadd.f32 %v1683_v13, %v1433_v10 }
 0x175   : > { %4052 = vmatmul.msk.f32.gmra.mxu3 %vm206_vm1, %v4018_v34  ;;  %v722_v34 = vld [vmem:[#allocation2 + $0xc0] sm:$0xff] }
 0x176   : > { %1807 = vst [vmem:[#allocation2 + $0x90] sm:$0xff] %v1775_v49  ;;  %4118 = vmatmul.msk.f32.gmra.mxu0 %vm206_vm1, %v3888_v59 }
 0x177   : > { %v1001_v21 = vpop.f32.mrf.mxu2 }
 0x178   : > { %v1091_v39 = vadd.f32 %v1001_v21, %v749_v15  ;;  %v1344_v40 = vpop.f32.mrf.mxu3  ;;  %v662_v41 = vpop.f32.mrf.mxu1  ;;  %v3958_v21 = vld [vmem:[%s4363_s11 + $0x98] sm:$0xff] }
 0x179   : > { %v750_v33 = vadd.f32 %v718_v27, %v662_v41  ;;  %v3894_v41 = vld [vmem:[%s4363_s11 + $0x9a] sm:$0xff] }
 0x17a   : > { %v1434_v45 = vadd.f32 %v1344_v40, %v1091_v39  ;;  %v4024_v40 = vld [vmem:[%s4363_s11 + $0x99] sm:$0xff] }
 0x17b   : > { %3921 = vmatmul.msk.f32.gmra.mxu1 %vm206_vm1, %v3887_v42  ;;  %v1689_v44 = vpop.f32.mrf.mxu0 }
 0x17c   : > { %3987 = vmatmul.msk.f32.gmra.mxu2 %vm206_vm1, %v3953_v43  ;;  %v1776_v56 = vadd.f32 %v1686_v28, %v1434_v45 }
 0x17d   : > { %4053 = vmatmul.msk.f32.gmra.mxu3 %vm206_vm1, %v4019_v3  ;;  %v723_v3 = vld [vmem:[#allocation2 + $0xc8] sm:$0xff] }
 0x17e   : > { %1808 = vst [vmem:[#allocation2 + $0x98] sm:$0xff] %v1776_v56  ;;  %4119 = vmatmul.msk.f32.gmra.mxu0 %vm206_vm1, %v3889_v62 }
 0x17f   : > { %v1004_v19 = vpop.f32.mrf.mxu2 }
 0x180   : > { %v1092_v14 = vadd.f32 %v1004_v19, %v750_v33  ;;  %v1347_v46 = vpop.f32.mrf.mxu3  ;;  %v665_v47 = vpop.f32.mrf.mxu1  ;;  %v3959_v19 = vld [vmem:[%s4363_s11 + $0xa8] sm:$0xff] }
 0x181   : > { %v751_v32 = vadd.f32 %v719_v20, %v665_v47  ;;  %v3895_v47 = vld [vmem:[%s4363_s11 + $0xaa] sm:$0xff] }
 0x182   : > { %v1435_v50 = vadd.f32 %v1347_v46, %v1092_v14  ;;  %v4025_v46 = vld [vmem:[%s4363_s11 + $0xa9] sm:$0xff] }
 0x183   : > { %3922 = vmatmul.msk.f32.gmra.mxu1 %vm206_vm1, %v3888_v59  ;;  %v1692_v4 = vpop.f32.mrf.mxu0 }
 0x184   : > { %3988 = vmatmul.msk.f32.gmra.mxu2 %vm206_vm1, %v3954_v48  ;;  %v1777_v63 = vadd.f32 %v1689_v44, %v1435_v50 }
 0x185   : > { %4054 = vmatmul.msk.f32.gmra.mxu3 %vm206_vm1, %v4020_v51  ;;  %v724_v51 = vld [vmem:[#allocation2 + $0xd0] sm:$0xff] }
 0x186   : > { %1809 = vst [vmem:[#allocation2 + $0xa0] sm:$0xff] %v1777_v63  ;;  %4120 = vmatmul.msk.f32.gmra.mxu0 %vm206_vm1, %v3890_v52 }
 0x187   : > { %v1007_v9 = vpop.f32.mrf.mxu2 }
 0x188   : > { %v1093_v53 = vadd.f32 %v1007_v9, %v751_v32  ;;  %v1350_v37 = vpop.f32.mrf.mxu3  ;;  %v668_v54 = vpop.f32.mrf.mxu1  ;;  %v3960_v9 = vld [vmem:[%s4363_s11 + $0xb0] sm:$0xff] }
 0x189   : > { %v752_v61 = vadd.f32 %v720_v31, %v668_v54  ;;  %v3896_v54 = vld [vmem:[%s4363_s11 + $0xb2] sm:$0xff] }
 0x18a   : > { %v1436_v18 = vadd.f32 %v1350_v37, %v1093_v53  ;;  %v4026_v37 = vld [vmem:[%s4363_s11 + $0xb1] sm:$0xff] }
 0x18b   : > { %3923 = vmatmul.msk.f32.gmra.mxu1 %vm206_vm1, %v3889_v62  ;;  %v1695_v60 = vpop.f32.mrf.mxu0 }
 0x18c   : > { %3989 = vmatmul.msk.f32.gmra.mxu2 %vm206_vm1, %v3955_v55  ;;  %v1778_v36 = vadd.f32 %v1692_v4, %v1436_v18 }
 0x18d   : > { %4055 = vmatmul.msk.f32.gmra.mxu3 %vm206_vm1, %v4021_v57  ;;  %v725_v57 = vld [vmem:[#allocation2 + $0xd8] sm:$0xff] }
 0x18e   : > { %1810 = vst [vmem:[#allocation2 + $0xa8] sm:$0xff] %v1778_v36  ;;  %4121 = vmatmul.msk.f32.gmra.mxu0 %vm206_vm1, %v3891_v58 }
 0x18f   : > { %v1010_v0 = vpop.f32.mrf.mxu2 }
 0x190   : > { %v1094_v1 = vadd.f32 %v1010_v0, %v752_v61  ;;  %v1353_v2 = vpop.f32.mrf.mxu3  ;;  %v671_v7 = vpop.f32.mrf.mxu1  ;;  %v3961_v0 = vld [vmem:[%s4363_s11 + $0xc0] sm:$0xff] }
 0x191   : > { %v753_v42 = vadd.f32 %v721_v12, %v671_v7  ;;  %v3897_v7 = vld [vmem:[%s4363_s11 + $0xc2] sm:$0xff] }
 0x192   : > { %v1437_v5 = vadd.f32 %v1353_v2, %v1094_v1  ;;  %v4027_v2 = vld [vmem:[%s4363_s11 + $0xc1] sm:$0xff] }
 0x193   : > { %3924 = vmatmul.msk.f32.gmra.mxu1 %vm206_vm1, %v3890_v52  ;;  %v1698_v16 = vpop.f32.mrf.mxu0 }
 0x194   : > { %3990 = vmatmul.msk.f32.gmra.mxu2 %vm206_vm1, %v3956_v25  ;;  %v1779_v22 = vadd.f32 %v1695_v60, %v1437_v5 }
 0x195   : > { %4056 = vmatmul.msk.f32.gmra.mxu3 %vm206_vm1, %v4022_v8  ;;  %v726_v8 = vld [vmem:[#allocation2 + $0xe0] sm:$0xff] }
 0x196   : > { %1811 = vst [vmem:[#allocation2 + $0xb0] sm:$0xff] %v1779_v22  ;;  %4122 = vmatmul.msk.f32.gmra.mxu0 %vm206_vm1, %v3892_v6 }
 0x197   : > { %v1013_v23 = vpop.f32.mrf.mxu2 }
 0x198   : > { %v1095_v13 = vadd.f32 %v1013_v23, %v753_v42  ;;  %v1356_v24 = vpop.f32.mrf.mxu3  ;;  %v674_v17 = vpop.f32.mrf.mxu1  ;;  %v3962_v23 = vld [vmem:[%s4363_s11 + $0xc8] sm:$0xff] }
 0x199   : > { %v754_v59 = vadd.f32 %v722_v34, %v674_v17  ;;  %v3898_v17 = vld [vmem:[%s4363_s11 + $0xca] sm:$0xff] }
 0x19a   : > { %v1438_v26 = vadd.f32 %v1356_v24, %v1095_v13  ;;  %v4028_v24 = vld [vmem:[%s4363_s11 + $0xc9] sm:$0xff] }
 0x19b   : > { %3925 = vmatmul.msk.f32.gmra.mxu1 %vm206_vm1, %v3891_v58  ;;  %v1701_v10 = vpop.f32.mrf.mxu0 }
 0x19c   : > { %3991 = vmatmul.msk.f32.gmra.mxu2 %vm206_vm1, %v3957_v11  ;;  %v1780_v30 = vadd.f32 %v1698_v16, %v1438_v26 }
 0x19d   : > { %4057 = vmatmul.msk.f32.gmra.mxu3 %vm206_vm1, %v4023_v29  ;;  %v727_v29 = vld [vmem:[#allocation2 + $0xe8] sm:$0xff] }
 0x19e   : > { %1812 = vst [vmem:[#allocation2 + $0xb8] sm:$0xff] %v1780_v30  ;;  %4123 = vmatmul.msk.f32.gmra.mxu0 %vm206_vm1, %v3893_v38 }
 0x19f   : > { %v1016_v49 = vpop.f32.mrf.mxu2 }
 0x1a0   : > { %v1096_v28 = vadd.f32 %v1016_v49, %v754_v59  ;;  %v1359_v35 = vpop.f32.mrf.mxu3  ;;  %v677_v15 = vpop.f32.mrf.mxu1  ;;  %v3963_v49 = vld [vmem:[%s4363_s11 + $0xd8] sm:$0xff] }
 0x1a1   : > { %v755_v62 = vadd.f32 %v723_v3, %v677_v15  ;;  %v3899_v15 = vld [vmem:[%s4363_s11 + $0xda] sm:$0xff] }
 0x1a2   : > { %v1439_v39 = vadd.f32 %v1359_v35, %v1096_v28  ;;  %v4029_v35 = vld [vmem:[%s4363_s11 + $0xd9] sm:$0xff] }
 0x1a3   : > { %3926 = vmatmul.msk.f32.gmra.mxu1 %vm206_vm1, %v3892_v6  ;;  %v1704_v45 = vpop.f32.mrf.mxu0 }
 0x1a4   : > { %3992 = vmatmul.msk.f32.gmra.mxu2 %vm206_vm1, %v3958_v21  ;;  %v1781_v43 = vadd.f32 %v1701_v10, %v1439_v39 }
 0x1a5   : > { %4058 = vmatmul.msk.f32.gmra.mxu3 %vm206_vm1, %v4024_v40  ;;  %v728_v40 = vld [vmem:[#allocation2 + $0xf0] sm:$0xff] }
 0x1a6   : > { %1813 = vst [vmem:[#allocation2 + $0xc0] sm:$0xff] %v1781_v43  ;;  %4124 = vmatmul.msk.f32.gmra.mxu0 %vm206_vm1, %v3894_v41 }
 0x1a7   : > { %v1019_v56 = vpop.f32.mrf.mxu2 }
 0x1a8   : > { %v1097_v44 = vadd.f32 %v1019_v56, %v755_v62  ;;  %v1362_v27 = vpop.f32.mrf.mxu3  ;;  %v680_v33 = vpop.f32.mrf.mxu1  ;;  %v3964_v56 = vld [vmem:[%s4363_s11 + $0xe0] sm:$0xff] }
 0x1a9   : > { %v756_v52 = vadd.f32 %v724_v51, %v680_v33  ;;  %v3900_v33 = vld [vmem:[%s4363_s11 + $0xe2] sm:$0xff] }
 0x1aa   : > { %v1440_v14 = vadd.f32 %v1362_v27, %v1097_v44  ;;  %v4030_v27 = vld [vmem:[%s4363_s11 + $0xe1] sm:$0xff] }
 0x1ab   : > { %3927 = vmatmul.msk.f32.gmra.mxu1 %vm206_vm1, %v3893_v38  ;;  %v1707_v50 = vpop.f32.mrf.mxu0 }
 0x1ac   : > { %3993 = vmatmul.msk.f32.gmra.mxu2 %vm206_vm1, %v3959_v19  ;;  %v1782_v48 = vadd.f32 %v1704_v45, %v1440_v14 }
 0x1ad   : > { %4059 = vmatmul.msk.f32.gmra.mxu3 %vm206_vm1, %v4025_v46  ;;  %v729_v46 = vld [vmem:[#allocation2 + $0xf8] sm:$0xff] }
 0x1ae   : > { %1814 = vst [vmem:[#allocation2 + $0xc8] sm:$0xff] %v1782_v48  ;;  %4125 = vmatmul.msk.f32.gmra.mxu0 %vm206_vm1, %v3895_v47 }
 0x1af   : > { %v1022_v63 = vpop.f32.mrf.mxu2 }
 0x1b0   : > { %v1098_v4 = vadd.f32 %v1022_v63, %v756_v52  ;;  %v1365_v20 = vpop.f32.mrf.mxu3  ;;  %v683_v32 = vpop.f32.mrf.mxu1  ;;  %v3965_v63 = vld [vmem:[%s4363_s11 + $0xf0] sm:$0xff] }
 0x1b1   : > { %v757_v58 = vadd.f32 %v725_v57, %v683_v32  ;;  %v3901_v32 = vld [vmem:[%s4363_s11 + $0xf2] sm:$0xff] }
 0x1b2   : > { %v1441_v53 = vadd.f32 %v1365_v20, %v1098_v4  ;;  %v4031_v20 = vld [vmem:[%s4363_s11 + $0xf1] sm:$0xff] }
 0x1b3   : > { %3928 = vmatmul.msk.f32.gmra.mxu1 %vm206_vm1, %v3894_v41  ;;  %v1710_v18 = vpop.f32.mrf.mxu0 }
 0x1b4   : > { %3994 = vmatmul.msk.f32.gmra.mxu2 %vm206_vm1, %v3960_v9  ;;  %v1783_v55 = vadd.f32 %v1707_v50, %v1441_v53 }
 0x1b5   : > { %4060 = vmatmul.msk.f32.gmra.mxu3 %vm206_vm1, %v4026_v37  ;;  %v2067_v37 = vld [vmem:[#allocation2] sm:$0xff] }
 0x1b6   : > { %1815 = vst [vmem:[#allocation2 + $0xd0] sm:$0xff] %v1783_v55  ;;  %4126 = vmatmul.msk.f32.gmra.mxu0 %vm206_vm1, %v3896_v54 }
 0x1b7   : > { %v1025_v36 = vpop.f32.mrf.mxu2 }
 0x1b8   : > { %v1099_v60 = vadd.f32 %v1025_v36, %v757_v58  ;;  %v1368_v31 = vpop.f32.mrf.mxu3  ;;  %v686_v61 = vpop.f32.mrf.mxu1  ;;  %v3966_v36 = vld [vmem:[%s4363_s11 + $0xf8] sm:$0xff] }
 0x1b9   : > { %v758_v6 = vadd.f32 %v726_v8, %v686_v61  ;;  %v3902_v61 = vld [vmem:[%s4363_s11 + $0xfa] sm:$0xff] }
 0x1ba   : > { %v1442_v1 = vadd.f32 %v1368_v31, %v1099_v60  ;;  %v4032_v31 = vld [vmem:[%s4363_s11 + $0xf9] sm:$0xff] }
 0x1bb   : > { %3929 = vmatmul.msk.f32.gmra.mxu1 %vm206_vm1, %v3895_v47  ;;  %v1713_v5 = vpop.f32.mrf.mxu0 }
 0x1bc   : > { %3995 = vmatmul.msk.f32.gmra.mxu2 %vm206_vm1, %v3961_v0  ;;  %v1784_v25 = vadd.f32 %v1710_v18, %v1442_v1 }
 0x1bd   : > { %4061 = vmatmul.msk.f32.gmra.mxu3 %vm206_vm1, %v4027_v2  ;;  %v2068_v2 = vld [vmem:[#allocation2 + $0x8] sm:$0xff] }
 0x1be   : > { %1816 = vst [vmem:[#allocation2 + $0xd8] sm:$0xff] %v1784_v25  ;;  %4127 = vmatmul.msk.f32.gmra.mxu0 %vm206_vm1, %v3897_v7 }
 0x1bf   : > { %v1028_v22 = vpop.f32.mrf.mxu2 }
 0x1c0   : > { %v1100_v16 = vadd.f32 %v1028_v22, %v758_v6  ;;  %v1371_v12 = vpop.f32.mrf.mxu3  ;;  %v689_v42 = vpop.f32.mrf.mxu1  ;;  %v3967_v22 = vld [vmem:[%s4363_s11 + $0x108] sm:$0xff] }
 0x1c1   : > { %v759_v38 = vadd.f32 %v727_v29, %v689_v42  ;;  %v3903_v42 = vld [vmem:[%s4363_s11 + $0x10a] sm:$0xff] }
 0x1c2   : > { %v1443_v13 = vadd.f32 %v1371_v12, %v1100_v16  ;;  %v4033_v12 = vld [vmem:[%s4363_s11 + $0x109] sm:$0xff] }
 0x1c3   : > { %3930 = vmatmul.msk.f32.gmra.mxu1 %vm206_vm1, %v3896_v54  ;;  %v1716_v26 = vpop.f32.mrf.mxu0 }
 0x1c4   : > { %3996 = vmatmul.msk.f32.gmra.mxu2 %vm206_vm1, %v3962_v23  ;;  %v1785_v11 = vadd.f32 %v1713_v5, %v1443_v13 }
 0x1c5   : > { %4062 = vmatmul.msk.f32.gmra.mxu3 %vm206_vm1, %v4028_v24  ;;  %v2069_v24 = vld [vmem:[#allocation2 + $0x10] sm:$0xff] }
 0x1c6   : > { %1817 = vst [vmem:[#allocation2 + $0xe0] sm:$0xff] %v1785_v11  ;;  %4128 = vmatmul.msk.f32.gmra.mxu0 %vm206_vm1, %v3898_v17 }
 0x1c7   : > { %v1031_v30 = vpop.f32.mrf.mxu2 }
 0x1c8   : > { %v1101_v10 = vadd.f32 %v1031_v30, %v759_v38  ;;  %v1374_v34 = vpop.f32.mrf.mxu3  ;;  %v692_v59 = vpop.f32.mrf.mxu1  ;;  %v3968_v30 = vld [vmem:[%s4363_s11 + $0x110] sm:$0xff] }
 0x1c9   : > { %v760_v41 = vadd.f32 %v728_v40, %v692_v59  ;;  %v3904_v59 = vld [vmem:[%s4363_s11 + $0x112] sm:$0xff] }
 0x1ca   : > { %v1444_v28 = vadd.f32 %v1374_v34, %v1101_v10  ;;  %v4034_v34 = vld [vmem:[%s4363_s11 + $0x111] sm:$0xff] }
 0x1cb   : > { %3931 = vmatmul.msk.f32.gmra.mxu1 %vm206_vm1, %v3897_v7  ;;  %v1719_v39 = vpop.f32.mrf.mxu0 }
 0x1cc   : > { %3997 = vmatmul.msk.f32.gmra.mxu2 %vm206_vm1, %v3963_v49  ;;  %v1786_v21 = vadd.f32 %v1716_v26, %v1444_v28 }
 0x1cd   : > { %4063 = vmatmul.msk.f32.gmra.mxu3 %vm206_vm1, %v4029_v35  ;;  %v2070_v35 = vld [vmem:[#allocation2 + $0x18] sm:$0xff] }
 0x1ce   : > { %1818 = vst [vmem:[#allocation2 + $0xe8] sm:$0xff] %v1786_v21  ;;  %4129 = vmatmul.msk.f32.gmra.mxu0 %vm206_vm1, %v3899_v15 }
 0x1cf   : > { %v1034_v43 = vpop.f32.mrf.mxu2 }
 0x1d0   : > { %v1102_v45 = vadd.f32 %v1034_v43, %v760_v41  ;;  %v1377_v3 = vpop.f32.mrf.mxu3  ;;  %v695_v62 = vpop.f32.mrf.mxu1  ;;  %v3969_v43 = vld [vmem:[%s4363_s11 + $0x120] sm:$0xff] }
 0x1d1   : > { %v761_v47 = vadd.f32 %v729_v46, %v695_v62  ;;  %v3905_v62 = vld [vmem:[%s4363_s11 + $0x122] sm:$0xff] }
 0x1d2   : > { %v1445_v44 = vadd.f32 %v1377_v3, %v1102_v45  ;;  %v4035_v3 = vld [vmem:[%s4363_s11 + $0x121] sm:$0xff] }
 0x1d3   : > { %3932 = vmatmul.msk.f32.gmra.mxu1 %vm206_vm1, %v3898_v17  ;;  %v1722_v14 = vpop.f32.mrf.mxu0 }
 0x1d4   : > { %3998 = vmatmul.msk.f32.gmra.mxu2 %vm206_vm1, %v3964_v56  ;;  %v1787_v19 = vadd.f32 %v1719_v39, %v1445_v44 }
 0x1d5   : > { %4064 = vmatmul.msk.f32.gmra.mxu3 %vm206_vm1, %v4030_v27  ;;  %v2071_v27 = vld [vmem:[#allocation2 + $0x20] sm:$0xff] }
 0x1d6   : > { %1819 = vst [vmem:[#allocation2 + $0xf0] sm:$0xff] %v1787_v19  ;;  %4130 = vmatmul.msk.f32.gmra.mxu0 %vm206_vm1, %v3900_v33 }
 0x1d7   : > { %v1037_v48 = vpop.f32.mrf.mxu2 }
 0x1d8   : > { %v1103_v50 = vadd.f32 %v1037_v48, %v761_v47  ;;  %v1380_v51 = vpop.f32.mrf.mxu3  ;;  %v1971_v52 = vpop.f32.mrf.mxu1  ;;  %v3970_v48 = vld [vmem:[%s4363_s11 + $0x128] sm:$0xff] }
 0x1d9   : > { %v2099_v54 = vadd.f32 %v2067_v37, %v1971_v52  ;;  %v3906_v52 = vld [vmem:[%s4363_s11 + $0x12a] sm:$0xff] }
 0x1da   : > { %v1446_v4 = vadd.f32 %v1380_v51, %v1103_v50  ;;  %v4036_v51 = vld [vmem:[%s4363_s11 + $0x129] sm:$0xff] }
 0x1db   : > { %3933 = vmatmul.msk.f32.gmra.mxu1 %vm206_vm1, %v3899_v15  ;;  %v2998_v53 = vpop.f32.mrf.mxu0 }
 0x1dc   : > { %3999 = vmatmul.msk.f32.gmra.mxu2 %vm206_vm1, %v3965_v63  ;;  %v1788_v9 = vadd.f32 %v1722_v14, %v1446_v4 }
 0x1dd   : > { %4065 = vmatmul.msk.f32.gmra.mxu3 %vm206_vm1, %v4031_v20  ;;  %v2072_v20 = vld [vmem:[#allocation2 + $0x28] sm:$0xff] }
 0x1de   : > { %1820 = vst [vmem:[#allocation2 + $0xf8] sm:$0xff] %v1788_v9  ;;  %4131 = vmatmul.msk.f32.gmra.mxu0 %vm206_vm1, %v3901_v32 }
 0x1df   : > { %v2314_v55 = vpop.f32.mrf.mxu2 }
 0x1e0   : > { %v2442_v18 = vadd.f32 %v2314_v55, %v2099_v54  ;;  %v2656_v57 = vpop.f32.mrf.mxu3  ;;  %v1974_v58 = vpop.f32.mrf.mxu1  ;;  %v3971_v55 = vld [vmem:[%s4363_s11 + $0x138] sm:$0xff] }
 0x1e1   : > { %v2100_v7 = vadd.f32 %v2068_v2, %v1974_v58  ;;  %v3907_v58 = vld [vmem:[%s4363_s11 + $0x13a] sm:$0xff] }
 0x1e2   : > { %v2784_v60 = vadd.f32 %v2656_v57, %v2442_v18  ;;  %v4037_v57 = vld [vmem:[%s4363_s11 + $0x139] sm:$0xff] }
 0x1e3   : > { %3934 = vmatmul.msk.f32.gmra.mxu1 %vm206_vm1, %v3900_v33  ;;  %v3001_v1 = vpop.f32.mrf.mxu0 }
 0x1e4   : > { %4000 = vmatmul.msk.f32.gmra.mxu2 %vm206_vm1, %v3966_v36  ;;  %v4942_v0 = vadd.f32 %v2998_v53, %v2784_v60 }
 0x1e5   : > { %4066 = vmatmul.msk.f32.gmra.mxu3 %vm206_vm1, %v4032_v31  ;;  %v2073_v31 = vld [vmem:[#allocation2 + $0x30] sm:$0xff] }
 0x1e6   : > { %4132 = vmatmul.msk.f32.gmra.mxu0 %vm206_vm1, %v3902_v61 }
 0x1e7   : > { %v2317_v25 = vpop.f32.mrf.mxu2 }
 0x1e8   : > { %v2443_v5 = vadd.f32 %v2317_v25, %v2100_v7  ;;  %v2659_v8 = vpop.f32.mrf.mxu3  ;;  %v1977_v6 = vpop.f32.mrf.mxu1 }
 0x1e9   : > { %v2101_v17 = vadd.f32 %v2069_v24, %v1977_v6  ;;  %v4038_v6 = vld [vmem:[%s4363_s11 + $0x141] sm:$0xff] }
 0x1ea   : > { %v2785_v16 = vadd.f32 %v2659_v8, %v2443_v5  ;;  %v3972_v5 = vld [vmem:[%s4363_s11 + $0x140] sm:$0xff] }
 0x1eb   : > { %3935 = vmatmul.msk.f32.gmra.mxu1 %vm206_vm1, %v3901_v32  ;;  %v3004_v13 = vpop.f32.mrf.mxu0 }
 0x1ec   : > { %4001 = vmatmul.msk.f32.gmra.mxu2 %vm206_vm1, %v3967_v22  ;;  %v4951_v23 = vadd.f32 %v3001_v1, %v2785_v16  ;;  %v3908_v22 = vld [vmem:[%s4363_s11 + $0x142] sm:$0xff] }
 0x1ed   : > { %4067 = vmatmul.msk.f32.gmra.mxu3 %vm206_vm1, %v4033_v12 }
 0x1ee   : > { %4133 = vmatmul.msk.f32.gmra.mxu0 %vm206_vm1, %v3903_v42 }
 0x1ef   : > { %v2320_v11 = vpop.f32.mrf.mxu2 }
 0x1f0   : > { %v2444_v26 = vadd.f32 %v2320_v11, %v2101_v17  ;;  %v2662_v29 = vpop.f32.mrf.mxu3  ;;  %v1980_v38 = vpop.f32.mrf.mxu1 }
 0x1f1   : > { %v2102_v15 = vadd.f32 %v2070_v35, %v1980_v38 }
 0x1f2   : > { %v2786_v10 = vadd.f32 %v2662_v29, %v2444_v26  ;;  %v3973_v29 = vld [vmem:[%s4363_s11 + $0x150] sm:$0xff] }
 0x1f3   : > { %3936 = vmatmul.msk.f32.gmra.mxu1 %vm206_vm1, %v3902_v61  ;;  %v3007_v28 = vpop.f32.mrf.mxu0 }
 0x1f4   : > { %4002 = vmatmul.msk.f32.gmra.mxu2 %vm206_vm1, %v3968_v30  ;;  %v4960_v49 = vadd.f32 %v3004_v13, %v2786_v10  ;;  %v4039_v30 = vld [vmem:[%s4363_s11 + $0x151] sm:$0xff] }
 0x1f5   : > { %4068 = vmatmul.msk.f32.gmra.mxu3 %vm206_vm1, %v4034_v34  ;;  %v3909_v10 = vld [vmem:[%s4363_s11 + $0x152] sm:$0xff] }
 0x1f6   : > { %4134 = vmatmul.msk.f32.gmra.mxu0 %vm206_vm1, %v3904_v59 }
 0x1f7   : > { %v2323_v21 = vpop.f32.mrf.mxu2 }
 0x1f8   : > { %v2445_v39 = vadd.f32 %v2323_v21, %v2102_v15  ;;  %v2665_v40 = vpop.f32.mrf.mxu3  ;;  %v1983_v41 = vpop.f32.mrf.mxu1 }
 0x1f9   : > { %v2103_v33 = vadd.f32 %v2071_v27, %v1983_v41  ;;  %v3974_v41 = vld [vmem:[%s4363_s11 + $0x158] sm:$0xff]  ;;  %v2076_v27 = vld [vmem:[#allocation2 + $0x48] sm:$0xff] }
 0x1fa   : > { %v2787_v45 = vadd.f32 %v2665_v40, %v2445_v39 }
 0x1fb   : > { %3937 = vmatmul.msk.f32.gmra.mxu1 %vm206_vm1, %v3903_v42  ;;  %v3010_v44 = vpop.f32.mrf.mxu0  ;;  %v2074_v42 = vld [vmem:[#allocation2 + $0x38] sm:$0xff] }
 0x1fc   : > { %4003 = vmatmul.msk.f32.gmra.mxu2 %vm206_vm1, %v3969_v43  ;;  %v4969_v56 = vadd.f32 %v3007_v28, %v2787_v45  ;;  %v2075_v28 = vld [vmem:[#allocation2 + $0x40] sm:$0xff] }
 0x1fd   : > { %4069 = vmatmul.msk.f32.gmra.mxu3 %vm206_vm1, %v4035_v3  ;;  %v4040_v45 = vld [vmem:[%s4363_s11 + $0x159] sm:$0xff] }
 0x1fe   : > { %4135 = vmatmul.msk.f32.gmra.mxu0 %vm206_vm1, %v3905_v62  ;;  %v3910_v3 = vld [vmem:[%s4363_s11 + $0x15a] sm:$0xff] }
 0x1ff   : > { %v2326_v19 = vpop.f32.mrf.mxu2 }
 0x200   : > { %v2446_v14 = vadd.f32 %v2326_v19, %v2103_v33  ;;  %v2668_v46 = vpop.f32.mrf.mxu3  ;;  %v1986_v47 = vpop.f32.mrf.mxu1 }
 0x201   : > { %v2104_v32 = vadd.f32 %v2072_v20, %v1986_v47 }
 0x202   : > { %v2788_v50 = vadd.f32 %v2668_v46, %v2446_v14 }
 0x203   : > { %3938 = vmatmul.msk.f32.gmra.mxu1 %vm206_vm1, %v3904_v59  ;;  %v3013_v4 = vpop.f32.mrf.mxu0 }
 0x204   : > { %4004 = vmatmul.msk.f32.gmra.mxu2 %vm206_vm1, %v3970_v48  ;;  %v4978_v63 = vadd.f32 %v3010_v44, %v2788_v50  ;;  %v3975_v48 = vld [vmem:[%s4363_s11 + $0x168] sm:$0xff] }
 0x205   : > { %4070 = vmatmul.msk.f32.gmra.mxu3 %vm206_vm1, %v4036_v51  ;;  %v4041_v51 = vld [vmem:[%s4363_s11 + $0x169] sm:$0xff] }
 0x206   : > { %4136 = vmatmul.msk.f32.gmra.mxu0 %vm206_vm1, %v3906_v52 }
 0x207   : > { %v2329_v9 = vpop.f32.mrf.mxu2 }
 0x208   : > { %v2447_v53 = vadd.f32 %v2329_v9, %v2104_v32  ;;  %v2671_v37 = vpop.f32.mrf.mxu3  ;;  %v1989_v54 = vpop.f32.mrf.mxu1  ;;  %v2077_v32 = vld [vmem:[#allocation2 + $0x50] sm:$0xff] }
 0x209   : > { %v2105_v61 = vadd.f32 %v2073_v31, %v1989_v54 }
 0x20a   : > { %v2789_v18 = vadd.f32 %v2671_v37, %v2447_v53 }
 0x20b   : > { %3939 = vmatmul.msk.f32.gmra.mxu1 %vm206_vm1, %v3905_v62  ;;  %v3016_v60 = vpop.f32.mrf.mxu0 }
 0x20c   : > { %4005 = vmatmul.msk.f32.gmra.mxu2 %vm206_vm1, %v3971_v55  ;;  %v4987_v36 = vadd.f32 %v3013_v4, %v2789_v18  ;;  %v3976_v18 = vld [vmem:[%s4363_s11 + $0x170] sm:$0xff] }
 0x20d   : > { %4071 = vmatmul.msk.f32.gmra.mxu3 %vm206_vm1, %v4037_v57 }
 0x20e   : > { %4137 = vmatmul.msk.f32.gmra.mxu0 %vm206_vm1, %v3907_v58 }
 0x20f   : > { %v2332_v1 = vpop.f32.mrf.mxu2 }
 0x210   : > { %v2448_v2 = vadd.f32 %v2332_v1, %v2105_v61  ;;  %v2674_v7 = vpop.f32.mrf.mxu3  ;;  %v1992_v25 = vpop.f32.mrf.mxu1  ;;  %v2078_v1 = vld [vmem:[#allocation2 + $0x58] sm:$0xff] }
 0x211   : > { %v2106_v13 = vadd.f32 %v2074_v42, %v1992_v25  ;;  %v3913_v42 = vld [vmem:[%s4363_s11 + $0x182] sm:$0xff] }
 0x212   : > { %v2790_v8 = vadd.f32 %v2674_v7, %v2448_v2 }
 0x213   : > { %3940 = vmatmul.msk.f32.gmra.mxu1 %vm206_vm1, %v3906_v52  ;;  %v3019_v12 = vpop.f32.mrf.mxu0  ;;  %v3911_v52 = vld [vmem:[%s4363_s11 + $0x16a] sm:$0xff] }
 0x214   : > { %4006 = vmatmul.msk.f32.gmra.mxu2 %vm206_vm1, %v3972_v5  ;;  %v4996_v16 = vadd.f32 %v3016_v60, %v2790_v8  ;;  %v3912_v60 = vld [vmem:[%s4363_s11 + $0x172] sm:$0xff] }
 0x215   : > { %4072 = vmatmul.msk.f32.gmra.mxu3 %vm206_vm1, %v4038_v6  ;;  %v3977_v6 = vld [vmem:[%s4363_s11 + $0x180] sm:$0xff] }
 0x216   : > { %4138 = vmatmul.msk.f32.gmra.mxu0 %vm206_vm1, %v3908_v22 }
 0x217   : > { %v2335_v24 = vpop.f32.mrf.mxu2 }
 0x218   : > { %v2449_v17 = vadd.f32 %v2335_v24, %v2106_v13  ;;  %v2677_v11 = vpop.f32.mrf.mxu3  ;;  %v1995_v26 = vpop.f32.mrf.mxu1 }
 0x219   : > { %v2107_v35 = vadd.f32 %v2075_v28, %v1995_v26  ;;  %v4044_v28 = vld [vmem:[%s4363_s11 + $0x189] sm:$0xff] }
 0x21a   : > { %v2791_v38 = vadd.f32 %v2677_v11, %v2449_v17  ;;  %v2079_v17 = vld [vmem:[#allocation2 + $0x60] sm:$0xff] }
 0x21b   : > { %3941 = vmatmul.msk.f32.gmra.mxu1 %vm206_vm1, %v3907_v58  ;;  %v3022_v59 = vpop.f32.mrf.mxu0  ;;  %v4042_v58 = vld [vmem:[%s4363_s11 + $0x171] sm:$0xff] }
 0x21c   : > { %4007 = vmatmul.msk.f32.gmra.mxu2 %vm206_vm1, %v3973_v29  ;;  %v5005_v34 = vadd.f32 %v3019_v12, %v2791_v38  ;;  %v4043_v12 = vld [vmem:[%s4363_s11 + $0x181] sm:$0xff] }
 0x21d   : > { %4073 = vmatmul.msk.f32.gmra.mxu3 %vm206_vm1, %v4039_v30 }
 0x21e   : > { %4139 = vmatmul.msk.f32.gmra.mxu0 %vm206_vm1, %v3909_v10 }
 0x21f   : > { %v2338_v15 = vpop.f32.mrf.mxu2 }
 0x220   : > { %v2450_v21 = vadd.f32 %v2338_v15, %v2107_v35  ;;  %v2680_v39 = vpop.f32.mrf.mxu3  ;;  %v1998_v40 = vpop.f32.mrf.mxu1  ;;  %v3914_v35 = vld [vmem:[%s4363_s11 + $0x18a] sm:$0xff] }
 0x221   : > { %v2108_v33 = vadd.f32 %v2076_v27, %v1998_v40 }
 0x222   : > { %v2792_v43 = vadd.f32 %v2680_v39, %v2450_v21  ;;  %v2080_v39 = vld [vmem:[#allocation2 + $0x68] sm:$0xff] }
 0x223   : > { %3942 = vmatmul.msk.f32.gmra.mxu1 %vm206_vm1, %v3908_v22  ;;  %v3025_v44 = vpop.f32.mrf.mxu0 }
 0x224   : > { %4008 = vmatmul.msk.f32.gmra.mxu2 %vm206_vm1, %v3974_v41  ;;  %v5014_v62 = vadd.f32 %v3022_v59, %v2792_v43 }
 0x225   : > { %4074 = vmatmul.msk.f32.gmra.mxu3 %vm206_vm1, %v4040_v45 }
 0x226   : > { %4140 = vmatmul.msk.f32.gmra.mxu0 %vm206_vm1, %v3910_v3 }
 0x227   : > { %v2341_v19 = vpop.f32.mrf.mxu2 }
 0x228   : > { %v2451_v14 = vadd.f32 %v2341_v19, %v2108_v33  ;;  %v2683_v46 = vpop.f32.mrf.mxu3  ;;  %v2001_v47 = vpop.f32.mrf.mxu1  ;;  %v4045_v33 = vld [vmem:[%s4363_s11 + $0x199] sm:$0xff] }
 0x229   : > { %v2109_v9 = vadd.f32 %v2077_v32, %v2001_v47  ;;  %v2081_v47 = vld [vmem:[#allocation2 + $0x70] sm:$0xff]  ;;  %v3980_v32 = vld [vmem:[%s4363_s11 + $0x1a0] sm:$0xff] }
 0x22a   : > { %v2793_v50 = vadd.f32 %v2683_v46, %v2451_v14  ;;  %v4111_v46 = vld [vmem:[%s4363_s11 + $0x19a] sm:$0xff] }
 0x22b   : > { %3943 = vmatmul.msk.f32.gmra.mxu1 %vm206_vm1, %v3909_v10  ;;  %v3028_v20 = vpop.f32.mrf.mxu0  ;;  %v3978_v10 = vld [vmem:[%s4363_s11 + $0x188] sm:$0xff] }
 0x22c   : > { %4009 = vmatmul.msk.f32.gmra.mxu2 %vm206_vm1, %v3975_v48  ;;  %v5023_v4 = vadd.f32 %v3025_v44, %v2793_v50  ;;  %v3979_v44 = vld [vmem:[%s4363_s11 + $0x198] sm:$0xff] }
 0x22d   : > { %4075 = vmatmul.msk.f32.gmra.mxu3 %vm206_vm1, %v4041_v51 }
 0x22e   : > { %4141 = vmatmul.msk.f32.gmra.mxu0 %vm206_vm1, %v3911_v52 }
 0x22f   : > { %v2344_v53 = vpop.f32.mrf.mxu2 }
 0x230   : > { %v2452_v37 = vadd.f32 %v2344_v53, %v2109_v9  ;;  %v2686_v54 = vpop.f32.mrf.mxu3  ;;  %v2004_v55 = vpop.f32.mrf.mxu1  ;;  %v4046_v53 = vld [vmem:[%s4363_s11 + $0x1a1] sm:$0xff] }
 0x231   : > { %v2110_v2 = vadd.f32 %v2078_v1, %v2004_v55  ;;  %v4112_v55 = vld [vmem:[%s4363_s11 + $0x1a2] sm:$0xff]  ;;  %s3581_s11 = sshll.u32 %s3578_s10, 4  ;;  %s3582_s11 = int_to_ptr.hbm [resolvable:$true] %s3581_s11 }
 0x232   : > { %v2794_v57 = vadd.f32 %v2686_v54, %v2452_v37  ;;  %s4215_s19 = sshra.s32 %s3582_s11, 4  ;;  %s4216_s19 = int_to_ptr.hbm [resolvable:$true] %s4215_s19 }
 0x233   : > { %3944 = vmatmul.msk.f32.gmra.mxu1 %vm206_vm1, %v3910_v3  ;;  %v3031_v61 = vpop.f32.mrf.mxu0  ;;  %s4217_s20 = scalar_lea.hbm %s4216_s19, 64  ;;  %p4222_p0 = scmp.lt.s32.totalorder %s4216_s19, %s5415_s3 }
 0x234   : > { %4010 = vmatmul.msk.f32.gmra.mxu2 %vm206_vm1, %v3976_v18  ;;  %v5032_v31 = vadd.f32 %v3028_v20, %v2794_v57  ;;  %v2082_v18 = vld [vmem:[#allocation2 + $0x78] sm:$0xff]  ;;  %p4218_p11 = scmp.ne.s32.totalorder %s4216_s19, %s4217_s20  ;;  %p4223_p1 = scmp.lt.s32.totalorder %s4221_s26, %s4217_s20 }
 0x235   : > { %4076 = vmatmul.msk.f32.gmra.mxu3 %vm206_vm1, %v4042_v58 }
 0x236   : > { %4142 = vmatmul.msk.f32.gmra.mxu0 %vm206_vm1, %v3912_v60  ;;  %p4219_p12 = pnand %p4218_p11, %p4325_p5  ;;  %p4224_p2 = por %p4223_p1, %p4222_p0 }
 0x237   : > { %v2347_v7 = vpop.f32.mrf.mxu2 }
 0x238   : > { %v2453_v25 = vadd.f32 %v2347_v7, %v2110_v2  ;;  %v2689_v5 = vpop.f32.mrf.mxu3  ;;  %v2007_v8 = vpop.f32.mrf.mxu1  ;;  %p4220_p13 = pneg %p4219_p12 }
 0x239   : > { %v2111_v11 = vadd.f32 %v2079_v17, %v2007_v8 }
 0x23a   : > { %v2795_v22 = vadd.f32 %v2689_v5, %v2453_v25  ;;  %v2083_v5 = vld [vmem:[#allocation2 + $0x80] sm:$0xff]  ;;  %p4225_p3 = pnand %p4224_p2, %p4220_p13 }
 0x23b   : > { %3945 = vmatmul.msk.f32.gmra.mxu1 %vm206_vm1, %v3911_v52  ;;  %v3034_v24 = vpop.f32.mrf.mxu0 }
 0x23c   : > { %4011 = vmatmul.msk.f32.gmra.mxu2 %vm206_vm1, %v3977_v6  ;;  %v5041_v13 = vadd.f32 %v3031_v61, %v2795_v22 }
 0x23d   : > { %4077 = vmatmul.msk.f32.gmra.mxu3 %vm206_vm1, %v4043_v12 }
 0x23e   : > { %5421 = vst [vmem:[#allocation6_spill] sm:$0xff] %v5041_v13  ;;  %4143 = vmatmul.msk.f32.gmra.mxu0 %vm206_vm1, %v3913_v42 }
 0x23f   : > { %v2350_v26 = vpop.f32.mrf.mxu2 }
 0x240   : > { %v2454_v29 = vadd.f32 %v2350_v26, %v2111_v11  ;;  %v2692_v38 = vpop.f32.mrf.mxu3  ;;  %v2010_v30 = vpop.f32.mrf.mxu1  ;;  %v2084_v26 = vld [vmem:[#allocation2 + $0x88] sm:$0xff] }
 0x241   : > { %v2112_v40 = vadd.f32 %v2080_v39, %v2010_v30  ;;  %v2085_v39 = vld [vmem:[#allocation2 + $0x90] sm:$0xff] }
 0x242   : > { %v2796_v59 = vadd.f32 %v2692_v38, %v2454_v29 }
 0x243   : > { %3946 = vmatmul.msk.f32.gmra.mxu1 %vm206_vm1, %v3912_v60  ;;  %v3037_v21 = vpop.f32.mrf.mxu0 }
 0x244   : > { %4012 = vmatmul.msk.f32.gmra.mxu2 %vm206_vm1, %v3978_v10  ;;  %v5050_v15 = vadd.f32 %v3034_v24, %v2796_v59 }
 0x245   : > { %4078 = vmatmul.msk.f32.gmra.mxu3 %vm206_vm1, %v4044_v28 }
 0x246   : > { %5422 = vst [vmem:[#allocation7_spill] sm:$0xff] %v5050_v15  ;;  %4144 = vmatmul.msk.f32.gmra.mxu0 %vm206_vm1, %v3914_v35 }
 0x247   : > { %v2353_v41 = vpop.f32.mrf.mxu2 }
 0x248   : > { %v2455_v43 = vadd.f32 %v2353_v41, %v2112_v40  ;;  %v2695_v45 = vpop.f32.mrf.mxu3  ;;  %v2013_v3 = vpop.f32.mrf.mxu1 }
 0x249   : > { %v2113_v48 = vadd.f32 %v2081_v47, %v2013_v3 }
 0x24a   : > { %v2797_v27 = vadd.f32 %v2695_v45, %v2455_v43 }
 0x24b   : > { %3947 = vmatmul.msk.f32.gmra.mxu1 %vm206_vm1, %v3913_v42  ;;  %v3040_v14 = vpop.f32.mrf.mxu0 }
 0x24c   : > { %4013 = vmatmul.msk.f32.gmra.mxu2 %vm206_vm1, %v3979_v44  ;;  %v5058_v19 = vadd.f32 %v3037_v21, %v2797_v27 }
 0x24d   : > { %4079 = vmatmul.msk.f32.gmra.mxu3 %vm206_vm1, %v4045_v33 }
 0x24e   : > { %4145 = vmatmul.msk.f32.gmra.mxu0 %vm206_vm1, %v4111_v46 }
 0x24f   : > { %v2356_v50 = vpop.f32.mrf.mxu2 }
 0x250   : > { %v2456_v51 = vadd.f32 %v2356_v50, %v2113_v48  ;;  %v2698_v52 = vpop.f32.mrf.mxu3  ;;  %v2016_v20 = vpop.f32.mrf.mxu1 }
 0x251   : > { %v2114_v57 = vadd.f32 %v2082_v18, %v2016_v20 }
 0x252   : > { %v2798_v9 = vadd.f32 %v2698_v52, %v2456_v51 }
 0x253   : > { %3948 = vmatmul.msk.f32.gmra.mxu1 %vm206_vm1, %v3914_v35  ;;  %v3043_v54 = vpop.f32.mrf.mxu0 }
 0x254   : > { %4014 = vmatmul.msk.f32.gmra.mxu2 %vm206_vm1, %v3980_v32  ;;  %v5067_v37 = vadd.f32 %v3040_v14, %v2798_v9  ;;  %v2086_v14 = vld [vmem:[#allocation2 + $0x98] sm:$0xff]  ;;  %v2087_v9 = vld [vmem:[#allocation2 + $0xa0] sm:$0xff] }
 0x255   : > { %4080 = vmatmul.msk.f32.gmra.mxu3 %vm206_vm1, %v4046_v53 }
 0x256   : > { %5423 = vst [vmem:[#allocation8_spill] sm:$0xff] %v5067_v37  ;;  %4146 = vmatmul.msk.f32.gmra.mxu0 %vm206_vm1, %v4112_v55 }
 0x257   : > { %v2359_v58 = vpop.f32.mrf.mxu2 }
 0x258   : > { %v2457_v60 = vadd.f32 %v2359_v58, %v2114_v57  ;;  %v2701_v61 = vpop.f32.mrf.mxu3  ;;  %v2019_v1 = vpop.f32.mrf.mxu1 }
 0x259   : > { %v2115_v8 = vadd.f32 %v2083_v5, %v2019_v1 }
 0x25a   : > { %v2799_v2 = vadd.f32 %v2701_v61, %v2457_v60 }
 0x25b   : > { %v3046_v25 = vpop.f32.mrf.mxu0 }
 0x25c   : > { %v5072_v7 = vadd.f32 %v3043_v54, %v2799_v2 }
 0x25f   : > { %v2362_v6 = vpop.f32.mrf.mxu2 }
 0x260   : > { %v2458_v22 = vadd.f32 %v2362_v6, %v2115_v8  ;;  %v2704_v12 = vpop.f32.mrf.mxu3  ;;  %v2022_v42 = vpop.f32.mrf.mxu1 }
 0x261   : > { %v2116_v29 = vadd.f32 %v2084_v26, %v2022_v42 }
 0x262   : > { %v2800_v24 = vadd.f32 %v2704_v12, %v2458_v22 }
 0x263   : > { %v3049_v11 = vpop.f32.mrf.mxu0 }
 0x264   : > { %v5074_v17 = vadd.f32 %v3046_v25, %v2800_v24 }
 0x267   : > { %v2365_v38 = vpop.f32.mrf.mxu2 }
 0x268   : > { %v2459_v30 = vadd.f32 %v2365_v38, %v2116_v29  ;;  %v2707_v10 = vpop.f32.mrf.mxu3  ;;  %v2025_v59 = vpop.f32.mrf.mxu1  ;;  %v3261_v29 = vmul.f32 %v4951_v23, %v4951_v23 }
 0x269   : > { %v2117_v40 = vadd.f32 %v2085_v39, %v2025_v59 }
 0x26a   : > { %v2801_v28 = vadd.f32 %v2707_v10, %v2459_v30  ;;  %v3260_v30 = vmul.f32 %v4942_v0, %v4942_v0  ;;  %v3262_v10 = vmul.f32 %v4960_v49, %v4960_v49 }
 0x26b   : > { %v3052_v21 = vpop.f32.mrf.mxu0 }
 0x26c   : > { %v5076_v35 = vadd.f32 %v3049_v11, %v2801_v28  ;;  %v3292_v39 = vadd.f32 %v3261_v29, %v3260_v30 }
 0x26f   : > { %v2368_v41 = vpop.f32.mrf.mxu2 }
 0x270   : > { %v2460_v43 = vadd.f32 %v2368_v41, %v2117_v40  ;;  %v2710_v45 = vpop.f32.mrf.mxu3  ;;  %v2028_v3 = vpop.f32.mrf.mxu1  ;;  %v3263_v40 = vmul.f32 %v4969_v56, %v4969_v56 }
 0x271   : > { %v2118_v46 = vadd.f32 %v2086_v14, %v2028_v3  ;;  %v3265_v14 = vmul.f32 %v4987_v36, %v4987_v36 }
 0x272   : > { %v2802_v44 = vadd.f32 %v2710_v45, %v2460_v43  ;;  %v3293_v43 = vadd.f32 %v3292_v39, %v3262_v10  ;;  %v3264_v45 = vmul.f32 %v4978_v63, %v4978_v63  ;;  %v3269_v10 = vmul.f32 %v5023_v4, %v5023_v4 }
 0x273   : > { %v3055_v33 = vpop.f32.mrf.mxu0 }
 0x274   : > { %v5078_v27 = vadd.f32 %v3052_v21, %v2802_v44  ;;  %v3222_v21 = vadd.f32 %v4951_v23, %v4942_v0 }
 0x276   : > { %v3223_v41 = vadd.f32 %v3222_v21, %v4960_v49 }
 0x277   : > { %v2371_v47 = vpop.f32.mrf.mxu2 }
 0x278   : > { %v2461_v48 = vadd.f32 %v2371_v47, %v2118_v46  ;;  %v2713_v50 = vpop.f32.mrf.mxu3  ;;  %v2031_v51 = vpop.f32.mrf.mxu1  ;;  %v3224_v44 = vadd.f32 %v3223_v41, %v4969_v56  ;;  %v3270_v41 = vmul.f32 %v5032_v31, %v5032_v31 }
 0x279   : > { %v2119_v53 = vadd.f32 %v2087_v9, %v2031_v51 }
 0x27a   : > { %v2803_v52 = vadd.f32 %v2713_v50, %v2461_v48  ;;  %v3225_v47 = vadd.f32 %v3224_v44, %v4978_v63  ;;  %v3266_v50 = vmul.f32 %v4996_v16, %v4996_v16 }
 0x27b   : > { %v3058_v32 = vpop.f32.mrf.mxu0 }
 0x27c   : > { %v5080_v20 = vadd.f32 %v3055_v33, %v2803_v52  ;;  %v3294_v33 = vadd.f32 %v3293_v43, %v3263_v40 }
 0x27e   : > { %v3295_v48 = vadd.f32 %v3294_v33, %v3264_v45 }
 0x27f   : > { %v2374_v54 = vpop.f32.mrf.mxu2 }
 0x280   : > { %v2462_v55 = vadd.f32 %v2374_v54, %v2119_v53  ;;  %v2716_v18 = vpop.f32.mrf.mxu3  ;;  %v5082_v57 = vpop.f32.mrf.mxu1  ;;  %v3296_v9 = vadd.f32 %v3295_v48, %v3265_v14  ;;  %v3267_v53 = vmul.f32 %v5005_v34, %v5005_v34  ;;  %v3271_v14 = vmul.f32 %v5041_v13, %v5041_v13 }
 0x282   : > { %v2804_v58 = vadd.f32 %v2716_v18, %v2462_v55  ;;  %v3297_v55 = vadd.f32 %v3296_v9, %v3266_v50  ;;  %v3268_v18 = vmul.f32 %v5014_v62, %v5014_v62  ;;  %v3272_v50 = vmul.f32 %v5050_v15, %v5050_v15 }
 0x283   : > { %v5086_v61 = vpop.f32.mrf.mxu0 }
 0x284   : > { %v5084_v60 = vadd.f32 %v3058_v32, %v2804_v58  ;;  %v3226_v32 = vadd.f32 %v3225_v47, %v4987_v36  ;;  %v3298_v30 = vadd.f32 %v3297_v55, %v3267_v53 }
 0x286   : > { %v3227_v54 = vadd.f32 %v3226_v32, %v4996_v16  ;;  %v3299_v40 = vadd.f32 %v3298_v30, %v3268_v18  ;;  %v3274_v30 = vmul.f32 %v5067_v37, %v5067_v37 }
 0x287   : > { %v5088_v1 = vpop.f32.mrf.mxu2 }
 0x288   : > { %v5090_v2 = vpop.f32.mrf.mxu3  ;;  %v5092_v25 = vpop.f32.mrf.mxu1  ;;  %v3228_v29 = vadd.f32 %v3227_v54, %v5005_v34  ;;  %v3300_v33 = vadd.f32 %v3299_v40, %v3269_v10  ;;  %v3273_v54 = vmul.f32 %v5058_v19, %v5058_v19  ;;  %v2088_v10 = vld [vmem:[#allocation2 + $0xa8] sm:$0xff] }
 0x289   : > { %v2120_v40 = vadd.f32 %v2088_v10, %v5082_v57 }
 0x28a   : > { %v3229_v39 = vadd.f32 %v3228_v29, %v5014_v62  ;;  %v3301_v48 = vadd.f32 %v3300_v33, %v3270_v41 }
 0x28b   : > { %v5094_v5 = vpop.f32.mrf.mxu0 }
 0x28c   : > { %v3230_v44 = vadd.f32 %v3229_v39, %v5023_v4  ;;  %v3302_v53 = vadd.f32 %v3301_v48, %v3271_v14  ;;  %v3275_v14 = vmul.f32 %v5072_v7, %v5072_v7 }
 0x28e   : > { %v3231_v47 = vadd.f32 %v3230_v44, %v5032_v31  ;;  %v3303_v29 = vadd.f32 %v3302_v53, %v3272_v50  ;;  %v2463_v50 = vadd.f32 %v5088_v1, %v2120_v40  ;;  %v2091_v1 = vld [vmem:[#allocation2 + $0xc0] sm:$0xff] }
 0x28f   : > { %v5096_v8 = vpop.f32.mrf.mxu2 }
 0x290   : > { %v5098_v6 = vpop.f32.mrf.mxu3  ;;  %v5100_v22 = vpop.f32.mrf.mxu1  ;;  %v3232_v9 = vadd.f32 %v3231_v47, %v5041_v13  ;;  %v3304_v33 = vadd.f32 %v3303_v29, %v3273_v54  ;;  %v2089_v47 = vld [vmem:[#allocation2 + $0xb0] sm:$0xff]  ;;  %v2090_v13 = vld [vmem:[#allocation2 + $0xb8] sm:$0xff]  ;;  %v2805_v40 = vadd.f32 %v5090_v2, %v2463_v50 }
 0x291   : > { %v2121_v48 = vadd.f32 %v2089_v47, %v5092_v25  ;;  %v3277_v25 = vmul.f32 %v5076_v35, %v5076_v35 }
 0x292   : > { %v3233_v18 = vadd.f32 %v3232_v9, %v5050_v15  ;;  %v3305_v53 = vadd.f32 %v3304_v33, %v3274_v30  ;;  %v3276_v15 = vmul.f32 %v5074_v17, %v5074_v17 }
 0x293   : > { %v5102_v12 = vpop.f32.mrf.mxu0  ;;  %v2464_v54 = vadd.f32 %v5096_v8, %v2121_v48  ;;  %v2092_v8 = vld [vmem:[#allocation2 + $0xc8] sm:$0xff] }
 0x294   : > { %v3234_v44 = vadd.f32 %v3233_v18, %v5058_v19  ;;  %v2122_v18 = vadd.f32 %v2090_v13, %v5100_v22  ;;  %v3306_v10 = vadd.f32 %v3305_v53, %v3275_v14  ;;  %v3278_v13 = vmul.f32 %v5078_v27, %v5078_v27  ;;  %v2093_v53 = vld [vmem:[#allocation2 + $0xd0] sm:$0xff] }
 0x295   : > { %v2806_v14 = vadd.f32 %v5098_v6, %v2464_v54  ;;  %v3280_v54 = vmul.f32 %v5084_v60, %v5084_v60 }
 0x296   : > { %v3235_v9 = vadd.f32 %v3234_v44, %v5067_v37  ;;  %v3307_v37 = vadd.f32 %v3306_v10, %v3276_v15  ;;  %v5212_v15 = vadd.f32 %v5086_v61, %v2805_v40 }
 0x297   : > { %v5104_v42 = vpop.f32.mrf.mxu2 }
 0x298   : > { %v5106_v24 = vpop.f32.mrf.mxu3  ;;  %v5108_v11 = vpop.f32.mrf.mxu1  ;;  %v3236_v29 = vadd.f32 %v3235_v9, %v5072_v7  ;;  %v2465_v44 = vadd.f32 %v5104_v42, %v2122_v18  ;;  %v3308_v50 = vadd.f32 %v3307_v37, %v3277_v25  ;;  %v3279_v42 = vmul.f32 %v5080_v20, %v5080_v20  ;;  %v2094_v25 = vld [vmem:[#allocation2 + $0xd8] sm:$0xff] }
 0x299   : > { %v2123_v30 = vadd.f32 %v2091_v1, %v5108_v11  ;;  %v5221_v37 = vadd.f32 %v5094_v5, %v2806_v14  ;;  %v3281_v40 = vmul.f32 %v5212_v15, %v5212_v15 }
 0x29a   : > { %v3237_v47 = vadd.f32 %v3236_v29, %v5074_v17  ;;  %v2807_v18 = vadd.f32 %v5106_v24, %v2465_v44  ;;  %v2095_v44 = vld [vmem:[#allocation2 + $0xe0] sm:$0xff] }
 0x29b   : > { %v5110_v26 = vpop.f32.mrf.mxu0 }
 0x29c   : > { %v3238_v11 = vadd.f32 %v3237_v47, %v5076_v35 }
 0x29f   : > { %v5114_v38 = vpop.f32.mrf.mxu2 }
 0x2a0   : > { %v5120_v59 = vpop.f32.mrf.mxu3  ;;  %v5122_v28 = vpop.f32.mrf.mxu1  ;;  %v2466_v9 = vadd.f32 %v5114_v38, %v2123_v30  ;;  %v3309_v38 = vadd.f32 %v3308_v50, %v3278_v13  ;;  %v5230_v30 = vadd.f32 %v5102_v12, %v2807_v18 }
 0x2a1   : > { %v2124_v48 = vadd.f32 %v2092_v8, %v5122_v28  ;;  %v3239_v28 = vadd.f32 %v3238_v11, %v5078_v27 }
 0x2a2   : > { %v2808_v10 = vadd.f32 %v5120_v59, %v2466_v9  ;;  %v2096_v9 = vld [vmem:[#allocation2 + $0xe8] sm:$0xff] }
 0x2a3   : > { %v5131_v3 = vpop.f32.mrf.mxu0  ;;  %v3240_v24 = vadd.f32 %v3239_v28, %v5080_v20 }
 0x2a5   : > { %v3241_v59 = vadd.f32 %v3240_v24, %v5084_v60 }
 0x2a7   : > { %v5136_v46 = vpop.f32.mrf.mxu2 }
 0x2a8   : > { %v5141_v51 = vpop.f32.mrf.mxu3  ;;  %v5143_v52 = vpop.f32.mrf.mxu1  ;;  %v2467_v6 = vadd.f32 %v5136_v46, %v2124_v48  ;;  %v3310_v46 = vadd.f32 %v3309_v38, %v3279_v42  ;;  %v5238_v48 = vadd.f32 %v5110_v26, %v2808_v10 }
 0x2a9   : > { %v2125_v29 = vadd.f32 %v2093_v53, %v5143_v52 }
 0x2aa   : > { %v2809_v5 = vadd.f32 %v5141_v51, %v2467_v6  ;;  %v3311_v14 = vadd.f32 %v3310_v46, %v3280_v54  ;;  %v3242_v51 = vadd.f32 %v3241_v59, %v5212_v15 }
 0x2ab   : > { %v5151_v58 = vpop.f32.mrf.mxu0 }
 0x2ac   : > { %v3312_v53 = vadd.f32 %v3311_v14, %v3281_v40  ;;  %v3243_v18 = vadd.f32 %v3242_v51, %v5221_v37 }
 0x2af   : > { %v5156_v21 = vpop.f32.mrf.mxu2 }
 0x2b0   : > { %v5161_v43 = vpop.f32.mrf.mxu3  ;;  %v5163_v45 = vpop.f32.mrf.mxu1  ;;  %v2468_v61 = vadd.f32 %v5156_v21, %v2125_v29 }
 0x2b1   : > { %v2126_v52 = vadd.f32 %v2094_v25, %v5163_v45  ;;  %v3282_v45 = vmul.f32 %v5221_v37, %v5221_v37 }
 0x2b2   : > { %v2810_v12 = vadd.f32 %v5161_v43, %v2468_v61  ;;  %v3284_v43 = vmul.f32 %v5238_v48, %v5238_v48 }
 0x2b3   : > { %v5171_v32 = vpop.f32.mrf.mxu0  ;;  %v3313_v6 = vadd.f32 %v3312_v53, %v3282_v45  ;;  %v2098_v45 = vld [vmem:[#allocation2 + $0xf8] sm:$0xff] }
 0x2b4   : > { %v5252_v28 = vadd.f32 %v5151_v58, %v2810_v12 }
 0x2b7   : > { %v5176_v55 = vpop.f32.mrf.mxu2 }
 0x2b8   : > { %v5181_v39 = vpop.f32.mrf.mxu3  ;;  %v2055_v41 = vpop.f32.mrf.mxu1  ;;  %v2469_v21 = vadd.f32 %v5176_v55, %v2126_v52  ;;  %v3283_v55 = vmul.f32 %v5230_v30, %v5230_v30 }
 0x2b9   : > { %v2127_v13 = vadd.f32 %v2095_v44, %v2055_v41  ;;  %v5245_v41 = vadd.f32 %v5131_v3, %v2809_v5  ;;  %v3286_v5 = vmul.f32 %v5252_v28, %v5252_v28 }
 0x2ba   : > { %v2811_v26 = vadd.f32 %v5181_v39, %v2469_v21  ;;  %v3314_v10 = vadd.f32 %v3313_v6, %v3283_v55 }
 0x2bb   : > { %v5192_v57 = vpop.f32.mrf.mxu0  ;;  %v3285_v3 = vmul.f32 %v5245_v41, %v5245_v41 }
 0x2bc   : > { %v5259_v24 = vadd.f32 %v5171_v32, %v2811_v26  ;;  %v3315_v40 = vadd.f32 %v3314_v10, %v3284_v43 }
 0x2be   : > { %v3316_v59 = vadd.f32 %v3315_v40, %v3285_v3  ;;  %v3287_v32 = vmul.f32 %v5259_v24, %v5259_v24 }
 0x2bf   : > { %v2398_v33 = vpop.f32.mrf.mxu2 }
 0x2c0   : > { %v2740_v22 = vpop.f32.mrf.mxu3  ;;  %v2058_v2 = vpop.f32.mrf.mxu1  ;;  %v2470_v42 = vadd.f32 %v2398_v33, %v2127_v13  ;;  %v2097_v33 = vld [vmem:[#allocation2 + $0xf0] sm:$0xff] }
 0x2c1   : > { %v2128_v50 = vadd.f32 %v2096_v9, %v2058_v2  ;;  %v3244_v2 = vadd.f32 %v3243_v18, %v5230_v30 }
 0x2c2   : > { %v2812_v54 = vadd.f32 %v2740_v22, %v2470_v42 }
 0x2c3   : > { %v3085_v1 = vpop.f32.mrf.mxu0  ;;  %v3245_v39 = vadd.f32 %v3244_v2, %v5238_v48 }
 0x2c4   : > { %v5265_v44 = vadd.f32 %v5192_v57, %v2812_v54 }
 0x2c5   : > { %v3246_v22 = vadd.f32 %v3245_v39, %v5245_v41 }
 0x2c7   : > { %v2401_v47 = vpop.f32.mrf.mxu2  ;;  %v3247_v21 = vadd.f32 %v3246_v22, %v5252_v28 }
 0x2c8   : > { %v2743_v8 = vpop.f32.mrf.mxu3  ;;  %v2061_v11 = vpop.f32.mrf.mxu1  ;;  %v2471_v29 = vadd.f32 %v2401_v47, %v2128_v50 }
 0x2c9   : > { %v2129_v38 = vadd.f32 %v2097_v33, %v2061_v11  ;;  %v3248_v12 = vadd.f32 %v3247_v21, %v5259_v24  ;;  %v3288_v11 = vmul.f32 %v5265_v44, %v5265_v44 }
 0x2ca   : > { %v2813_v46 = vadd.f32 %v2743_v8, %v2471_v29  ;;  %v3317_v8 = vadd.f32 %v3316_v59, %v3286_v5 }
 0x2cb   : > { %v3088_v61 = vpop.f32.mrf.mxu0  ;;  %v3249_v42 = vadd.f32 %v3248_v12, %v5265_v44 }
 0x2cc   : > { %v3155_v14 = vadd.f32 %v3085_v1, %v2813_v46  ;;  %v3318_v50 = vadd.f32 %v3317_v8, %v3287_v32 }
 0x2ce   : > { %v3289_v55 = vmul.f32 %v3155_v14, %v3155_v14  ;;  %v3319_v29 = vadd.f32 %v3318_v50, %v3288_v11  ;;  %v3250_v6 = vadd.f32 %v3249_v42, %v3155_v14 }
 0x2cf   : > { %v2404_v25 = vpop.f32.mrf.mxu2 }
 0x2d0   : > { %v2472_v52 = vadd.f32 %v2404_v25, %v2129_v38  ;;  %v2746_v58 = vpop.f32.mrf.mxu3  ;;  %v2064_v13 = vpop.f32.mrf.mxu1  ;;  %v3320_v33 = vadd.f32 %v3319_v29, %v3289_v55 }
 0x2d1   : > { %v2130_v9 = vadd.f32 %v2098_v45, %v2064_v13 }
 0x2d2   : > { %v2814_v47 = vadd.f32 %v2746_v58, %v2472_v52 }
 0x2d3   : > { %v3091_v26 = vpop.f32.mrf.mxu0 }
 0x2d4   : > { %v3156_v51 = vadd.f32 %v3088_v61, %v2814_v47 }
 0x2d6   : > { %v3290_v43 = vmul.f32 %v3156_v51, %v3156_v51  ;;  %v3251_v2 = vadd.f32 %v3250_v6, %v3156_v51 }
 0x2d7   : > { %v2407_v57 = vpop.f32.mrf.mxu2 }
 0x2d8   : > { %v2473_v53 = vadd.f32 %v2407_v57, %v2130_v9  ;;  %v2749_v18 = vpop.f32.mrf.mxu3  ;;  %v3321_v54 = vadd.f32 %v3320_v33, %v3290_v43 }
 0x2da   : > { %v2815_v1 = vadd.f32 %v2749_v18, %v2473_v53 }
 0x2dc   : > { %v3157_v38 = vadd.f32 %v3091_v26, %v2815_v1 }
 0x2de   : > { %v3252_v10 = vadd.f32 %v3251_v2, %v3157_v38  ;;  %v3291_v3 = vmul.f32 %v3157_v38, %v3157_v38 }
 0x2e0   : > { %v3253_v25 = vrot.slane %v3252_v10, 4  ;;  %v3322_v61 = vadd.f32 %v3321_v54, %v3291_v3 }
 0x2e2   : > { %v3254_v39 = vadd.f32 %v3253_v25, %v3252_v10  ;;  %v3323_v52 = vrot.slane %v3322_v61, 4 }
 0x2e4   : > { %v3255_v46 = vrot.slane %v3254_v39, 2  ;;  %v3324_v58 = vadd.f32 %v3323_v52, %v3322_v61 }
 0x2e6   : > { %v3256_v40 = vadd.f32 %v3255_v46, %v3254_v39  ;;  %v3325_v5 = vrot.slane %v3324_v58, 2 }
 0x2e8   : > { %v3257_v22 = vrot.slane %v3256_v40, 1  ;;  %v3326_v47 = vadd.f32 %v3325_v5, %v3324_v58 }
 0x2ea   : > { %v3258_v59 = vadd.f32 %v3257_v22, %v3256_v40  ;;  %v3327_v13 = vrot.slane %v3326_v47, 1 }
 0x2ec   : > { %v5274_v21 = vmul.f32 0.00390625, %v3258_v59  ;;  %v3328_v32 = vadd.f32 %v3327_v13, %v3326_v47 }
 0x2ee   : > { %v3329_v8 = vmul.f32 0.00390625, %v3328_v32  ;;  %v3330_v45 = vmul.f32 %v5274_v21, %v5274_v21  ;;  %v3360_v18 = vsub.f32 %v5265_v44, %v5274_v21  ;;  %v3361_v26 = vsub.f32 %v3155_v14, %v5274_v21 }
 0x2ef   : > { %v3362_v29 = vsub.f32 %v3156_v51, %v5274_v21  ;;  %v3363_v6 = vsub.f32 %v3157_v38, %v5274_v21  ;;  %v3332_v14 = vsub.f32 %v4942_v0, %v5274_v21  ;;  %v3333_v51 = vsub.f32 %v4951_v23, %v5274_v21 }
 0x2f0   : > { %v3331_v12 = vsub.f32 %v3329_v8, %v3330_v45  ;;  %v3334_v38 = vsub.f32 %v4960_v49, %v5274_v21  ;;  %v3335_v52 = vsub.f32 %v4969_v56, %v5274_v21  ;;  %v3336_v0 = vsub.f32 %v4978_v63, %v5274_v21 }
 0x2f1   : > { %v3337_v23 = vsub.f32 %v4987_v36, %v5274_v21  ;;  %v3338_v49 = vsub.f32 %v4996_v16, %v5274_v21  ;;  %v3339_v56 = vsub.f32 %v5005_v34, %v5274_v21  ;;  %v3340_v63 = vsub.f32 %v5014_v62, %v5274_v21 }
 0x2f2   : > { %v3364_v9 = vadd.f32 1e-05, %v3331_v12  ;;  %v3341_v13 = vsub.f32 %v5023_v4, %v5274_v21  ;;  %v3342_v8 = vsub.f32 %v5032_v31, %v5274_v21  ;;  %v5424_v12 = vld [vmem:[#allocation6_spill] sm:$0xff]  ;;  %v3345_v31 = vsub.f32 %v5058_v19, %v5274_v21 }
 0x2f3   : > { %v3343_v62 = vsub.f32 %v5424_v12, %v5274_v21  ;;  %v3348_v19 = vsub.f32 %v5074_v17, %v5274_v21  ;;  %v3351_v17 = vsub.f32 %v5080_v20, %v5274_v21  ;;  %v3354_v20 = vsub.f32 %v5221_v37, %v5274_v21 }
 0x2f4   : > { %4199 = vrsqrt.f32 %v3364_v9  ;;  %vm3371_vm3 = vweird.f32 %v3364_v9 }
 0x2fa   : > { %v4200_v11 = vpop.eup %4199 }
 0x2fb   : > { %v3366_v57 = vmul.f32 %v4200_v11, %v3364_v9  ;;  %vm3372_vm2 = vweird.f32 %v4200_v11 }
 0x2fc   : > { %vm3373_vm4 = vmor %vm3371_vm3, %vm3372_vm2 }
 0x2fd   : > { %v3367_v50 = vmul.f32 %v4200_v11, %v3366_v57  ;;  %v5425_v57 = vld [vmem:[#allocation7_spill] sm:$0xff] }
 0x2ff   : > { %v3368_v42 = vmul.f32 0.5, %v3367_v50  ;;  %v3344_v50 = vsub.f32 %v5425_v57, %v5274_v21 }
 0x301   : > { %v3369_v53 = vsub.f32 1.5, %v3368_v42 }
 0x303   : > { %v3370_v55 = vmul.f32 %v4200_v11, %v3369_v53 }
 0x305   : > { %v5283_v1 = vsel %vm3373_vm4, %v4200_v11, %v3370_v55 }
 0x306   : > { %v3403_v43 = vmul.f32 %v5283_v1, %v3360_v18  ;;  %v3404_v33 = vmul.f32 %v5283_v1, %v3361_v26  ;;  %v3405_v2 = vmul.f32 %v5283_v1, %v3362_v29  ;;  %v3406_v54 = vmul.f32 %v5283_v1, %v3363_v6  ;;  %v5426_v18 = vld [vmem:[#allocation8_spill] sm:$0xff] }
 0x307   : > { %v3375_v61 = vmul.f32 %v5283_v1, %v3332_v14  ;;  %v3376_v39 = vmul.f32 %v5283_v1, %v3333_v51  ;;  %v3377_v46 = vmul.f32 %v5283_v1, %v3334_v38  ;;  %v3378_v58 = vmul.f32 %v5283_v1, %v3335_v52 }
 0x308   : > { %v3435_v10 = vmax.f32 %v3403_v43, 0.0  ;;  %v3436_v3 = vmax.f32 %v3404_v33, 0.0  ;;  %v3437_v44 = vmax.f32 %v3405_v2, 0.0  ;;  %v3438_v25 = vmax.f32 %v3406_v54, 0.0 }
 0x309   : > { %v3379_v40 = vmul.f32 %v5283_v1, %v3336_v0  ;;  %v3407_v5 = vmax.f32 %v3375_v61, 0.0  ;;  %v3408_v22 = vmax.f32 %v3376_v39, 0.0  ;;  %v3380_v47 = vmul.f32 %v5283_v1, %v3337_v23 }
 0x30a   : > { %3467 = vst [vmem:[#allocation2 + $0xe0] sm:$0xff] %v3435_v10  ;;  %v3381_v59 = vmul.f32 %v5283_v1, %v3338_v49  ;;  %v3409_v36 = vmax.f32 %v3377_v46, 0.0  ;;  %v3382_v16 = vmul.f32 %v5283_v1, %v3339_v56  ;;  %v3410_v32 = vmax.f32 %v3378_v58, 0.0 }
 0x30b   : > { %3468 = vst [vmem:[#allocation2 + $0xe8] sm:$0xff] %v3436_v3  ;;  %v3383_v34 = vmul.f32 %v5283_v1, %v3340_v63  ;;  %v3411_v45 = vmax.f32 %v3379_v40, 0.0  ;;  %v3384_v9 = vmul.f32 %v5283_v1, %v3341_v13  ;;  %v3412_v11 = vmax.f32 %v3380_v47, 0.0 }
 0x30c   : > { %3469 = vst [vmem:[#allocation2 + $0xf0] sm:$0xff] %v3437_v44  ;;  %v3385_v4 = vmul.f32 %v5283_v1, %v3342_v8  ;;  %v3413_v42 = vmax.f32 %v3381_v59, 0.0  ;;  %v3386_v53 = vmul.f32 %v5283_v1, %v3343_v62  ;;  %v3414_v55 = vmax.f32 %v3382_v16, 0.0 }
 0x30d   : > { %3470 = vst [vmem:[#allocation2 + $0xf8] sm:$0xff] %v3438_v25  ;;  %v3346_v26 = vsub.f32 %v5426_v18, %v5274_v21  ;;  %v3387_v29 = vmul.f32 %v5283_v1, %v3344_v50  ;;  %v3415_v6 = vmax.f32 %v3383_v34, 0.0  ;;  %v3347_v43 = vsub.f32 %v5072_v7, %v5274_v21 }
 0x30e   : > { %3439 = vst [vmem:[#allocation2] sm:$0xff] %v3407_v5  ;;  %v3388_v33 = vmul.f32 %v5283_v1, %v3345_v31  ;;  %v3416_v2 = vmax.f32 %v3384_v9, 0.0  ;;  %v3417_v10 = vmax.f32 %v3385_v4, 0.0  ;;  %v3349_v3 = vsub.f32 %v5076_v35, %v5274_v21 }
 0x30f   : > { %3440 = vst [vmem:[#allocation2 + $0x8] sm:$0xff] %v3408_v22  ;;  %v3389_v54 = vmul.f32 %v5283_v1, %v3346_v26  ;;  %v3390_v44 = vmul.f32 %v5283_v1, %v3347_v43  ;;  %v3418_v25 = vmax.f32 %v3386_v53, 0.0  ;;  %v3350_v7 = vsub.f32 %v5078_v27, %v5274_v21 }
 0x310   : > { %3441 = vst [vmem:[#allocation2 + $0x10] sm:$0xff] %v3409_v36  ;;  %v3391_v14 = vmul.f32 %v5283_v1, %v3348_v19  ;;  %v3419_v51 = vmax.f32 %v3387_v29, 0.0  ;;  %v3392_v38 = vmul.f32 %v5283_v1, %v3349_v3  ;;  %v3420_v61 = vmax.f32 %v3388_v33, 0.0 }
 0x311   : > { %3442 = vst [vmem:[#allocation2 + $0x18] sm:$0xff] %v3410_v32  ;;  %v3352_v35 = vsub.f32 %v5084_v60, %v5274_v21  ;;  %v3393_v39 = vmul.f32 %v5283_v1, %v3350_v7  ;;  %v3421_v52 = vmax.f32 %v3389_v54, 0.0  ;;  %v3353_v27 = vsub.f32 %v5212_v15, %v5274_v21 }
 0x312   : > { %3443 = vst [vmem:[#allocation2 + $0x20] sm:$0xff] %v3411_v45  ;;  %v3394_v0 = vmul.f32 %v5283_v1, %v3351_v17  ;;  %v3422_v46 = vmax.f32 %v3390_v44, 0.0  ;;  %v3423_v58 = vmax.f32 %v3391_v14, 0.0  ;;  %v3355_v60 = vsub.f32 %v5230_v30, %v5274_v21  ;;  %v3499_v53 = vld [vmem:[#allocation2 + $0xe0] ss:$2 sm:$0xff] }
 0x313   : > { %3444 = vst [vmem:[#allocation2 + $0x28] sm:$0xff] %v3412_v11  ;;  %v3395_v23 = vmul.f32 %v5283_v1, %v3352_v35  ;;  %v3396_v49 = vmul.f32 %v5283_v1, %v3353_v27  ;;  %v3424_v40 = vmax.f32 %v3392_v38, 0.0  ;;  %v3356_v15 = vsub.f32 %v5238_v48, %v5274_v21 }
 0x314   : > { %3445 = vst [vmem:[#allocation2 + $0x30] sm:$0xff] %v3413_v42  ;;  %v3397_v5 = vmul.f32 %v5283_v1, %v3354_v20  ;;  %v3425_v37 = vmax.f32 %v3393_v39, 0.0  ;;  %v3357_v22 = vsub.f32 %v5245_v41, %v5274_v21  ;;  %v3398_v56 = vmul.f32 %v5283_v1, %v3355_v60  ;;  %v3533_v43 = vld [vmem:[#allocation2 + $0xf1] ss:$2 sm:$0xff] }
 0x315   : > { %3446 = vst [vmem:[#allocation2 + $0x38] sm:$0xff] %v3414_v55  ;;  %v3426_v30 = vmax.f32 %v3394_v0, 0.0  ;;  %v3358_v48 = vsub.f32 %v5252_v28, %v5274_v21  ;;  %v3399_v13 = vmul.f32 %v5283_v1, %v3356_v15  ;;  %v3427_v16 = vmax.f32 %v3395_v23, 0.0 }
 0x316   : > { %3447 = vst [vmem:[#allocation2 + $0x40] sm:$0xff] %v3415_v6  ;;  %v3471_v47 = vld [vmem:[#allocation2] ss:$2 sm:$0xff]  ;;  %v3503_v59 = vld [vmem:[#allocation2 + $0x1] ss:$2 sm:$0xff]  ;;  %v3359_v41 = vsub.f32 %v5259_v24, %v5274_v21  ;;  %v3400_v34 = vmul.f32 %v5283_v1, %v3357_v22  ;;  %v3428_v45 = vmax.f32 %v3396_v49, 0.0 }
 0x317   : > { %3448 = vst [vmem:[#allocation2 + $0x48] sm:$0xff] %v3416_v2  ;;  %v3401_v9 = vmul.f32 %v5283_v1, %v3358_v48  ;;  %v3429_v11 = vmax.f32 %v3397_v5, 0.0  ;;  %v3430_v4 = vmax.f32 %v3398_v56, 0.0  ;;  %v3531_v24 = vld [vmem:[#allocation2 + $0xe1] ss:$2 sm:$0xff]  ;;  %v3431_v21 = vmax.f32 %v3399_v13, 0.0 }
 0x318   : > { %3449 = vst [vmem:[#allocation2 + $0x50] sm:$0xff] %v3417_v10  ;;  %v3473_v63 = vld [vmem:[#allocation2 + $0x10] ss:$2 sm:$0xff]  ;;  %v3505_v36 = vld [vmem:[#allocation2 + $0x11] ss:$2 sm:$0xff]  ;;  %v3402_v50 = vmul.f32 %v5283_v1, %v3359_v41  ;;  %v3534_v26 = vmax.f32 %v3471_v47, %v3503_v59  ;;  %v3432_v33 = vmax.f32 %v3400_v34, 0.0 }
 0x319   : > { %3450 = vst [vmem:[#allocation2 + $0x58] sm:$0xff] %v3418_v25  ;;  %v3535_v29 = vmax.f32 %v3473_v63, %v3505_v36  ;;  %v3501_v6 = vld [vmem:[#allocation2 + $0xf0] ss:$2 sm:$0xff]  ;;  %v3433_v54 = vmax.f32 %v3401_v9, 0.0 }
 0x31a   : > { %3451 = vst [vmem:[#allocation2 + $0x60] sm:$0xff] %v3419_v51  ;;  %v3475_v32 = vld [vmem:[#allocation2 + $0x20] ss:$2 sm:$0xff]  ;;  %v3507_v8 = vld [vmem:[#allocation2 + $0x21] ss:$2 sm:$0xff]  ;;  %v3434_v25 = vmax.f32 %v3402_v50, 0.0  ;;  %v3549_v35 = vmax.f32 %v3501_v6, %v3533_v43 }
 0x31b   : > { %3452 = vst [vmem:[#allocation2 + $0x68] sm:$0xff] %v3420_v61  ;;  %v3536_v2 = vmax.f32 %v3475_v32, %v3507_v8  ;;  %v3550_v38 = vmax.f32 %v3534_v26, %v3535_v29  ;;  %v3548_v61 = vmax.f32 %v3499_v53, %v3531_v24 }
 0x31c   : > { %3453 = vst [vmem:[#allocation2 + $0x70] sm:$0xff] %v3421_v52  ;;  %v3477_v12 = vld [vmem:[#allocation2 + $0x30] ss:$2 sm:$0xff]  ;;  %v3509_v62 = vld [vmem:[#allocation2 + $0x31] ss:$2 sm:$0xff] }
 0x31d   : > { %3454 = vst [vmem:[#allocation2 + $0x78] sm:$0xff] %v3422_v46  ;;  %v3537_v19 = vmax.f32 %v3477_v12, %v3509_v62  ;;  %v3557_v49 = vmax.f32 %v3548_v61, %v3549_v35 }
 0x31e   : > { %3455 = vst [vmem:[#allocation2 + $0x80] sm:$0xff] %v3423_v58  ;;  %v3479_v28 = vld [vmem:[#allocation2 + $0x40] ss:$2 sm:$0xff]  ;;  %v3511_v57 = vld [vmem:[#allocation2 + $0x41] ss:$2 sm:$0xff] }
 0x31f   : > { %3456 = vst [vmem:[#allocation2 + $0x88] sm:$0xff] %v3424_v40  ;;  %v3538_v3 = vmax.f32 %v3479_v28, %v3511_v57  ;;  %v3551_v52 = vmax.f32 %v3536_v2, %v3537_v19 }
 0x320   : > { %3457 = vst [vmem:[#allocation2 + $0x90] sm:$0xff] %v3425_v37  ;;  %v3481_v42 = vld [vmem:[#allocation2 + $0x50] ss:$2 sm:$0xff]  ;;  %v3513_v31 = vld [vmem:[#allocation2 + $0x51] ss:$2 sm:$0xff] }
 0x321   : > { %3458 = vst [vmem:[#allocation2 + $0x98] sm:$0xff] %v3426_v30  ;;  %v3539_v44 = vmax.f32 %v3481_v42, %v3513_v31 }
 0x322   : > { %3459 = vst [vmem:[#allocation2 + $0xa0] sm:$0xff] %v3427_v16  ;;  %v3483_v55 = vld [vmem:[#allocation2 + $0x60] ss:$2 sm:$0xff]  ;;  %v3515_v18 = vld [vmem:[#allocation2 + $0x61] ss:$2 sm:$0xff] }
 0x323   : > { %3460 = vst [vmem:[#allocation2 + $0xa8] sm:$0xff] %v3428_v45  ;;  %v3540_v7 = vmax.f32 %v3483_v55, %v3515_v18  ;;  %v3552_v46 = vmax.f32 %v3538_v3, %v3539_v44 }
 0x324   : > { %3461 = vst [vmem:[#allocation2 + $0xb0] sm:$0xff] %v3429_v11  ;;  %v3485_v1 = vld [vmem:[#allocation2 + $0x70] ss:$2 sm:$0xff]  ;;  %v3517_v10 = vld [vmem:[#allocation2 + $0x71] ss:$2 sm:$0xff] }
 0x325   : > { %3462 = vst [vmem:[#allocation2 + $0xb8] sm:$0xff] %v3430_v4  ;;  %v3541_v14 = vmax.f32 %v3485_v1, %v3517_v10 }
 0x326   : > { %3463 = vst [vmem:[#allocation2 + $0xc0] sm:$0xff] %v3431_v21  ;;  %v3487_v51 = vld [vmem:[#allocation2 + $0x80] ss:$2 sm:$0xff]  ;;  %v3519_v17 = vld [vmem:[#allocation2 + $0x81] ss:$2 sm:$0xff] }
 0x327   : > { %3464 = vst [vmem:[#allocation2 + $0xc8] sm:$0xff] %v3432_v33  ;;  %v3542_v39 = vmax.f32 %v3487_v51, %v3519_v17  ;;  %v3553_v23 = vmax.f32 %v3540_v7, %v3541_v14 }
 0x328   : > { %3465 = vst [vmem:[#allocation2 + $0xd0] sm:$0xff] %v3433_v54  ;;  %v3489_v27 = vld [vmem:[#allocation2 + $0x90] ss:$2 sm:$0xff]  ;;  %v3521_v0 = vld [vmem:[#allocation2 + $0x91] ss:$2 sm:$0xff] }
 0x329   : > { %3466 = vst [vmem:[#allocation2 + $0xd8] sm:$0xff] %v3434_v25  ;;  %v3543_v20 = vmax.f32 %v3489_v27, %v3521_v0 }
 0x32a   : > { %v3491_v58 = vld [vmem:[#allocation2 + $0xa0] ss:$2 sm:$0xff]  ;;  %v3523_v60 = vld [vmem:[#allocation2 + $0xa1] ss:$2 sm:$0xff]  ;;  %3558 = vst [vmem:[%s163_s7] sm:$0xff] %v3550_v38 }
 0x32b   : > { %v3544_v40 = vmax.f32 %v3491_v58, %v3523_v60  ;;  %v3554_v15 = vmax.f32 %v3542_v39, %v3543_v20  ;;  %3559 = vst [vmem:[%s163_s7 + $0x8] sm:$0xff] %v3551_v52 }
 0x32c   : > { %v3493_v5 = vld [vmem:[#allocation2 + $0xb0] ss:$2 sm:$0xff]  ;;  %v3525_v37 = vld [vmem:[#allocation2 + $0xb1] ss:$2 sm:$0xff]  ;;  %3560 = vst [vmem:[%s163_s7 + $0x10] sm:$0xff] %v3552_v46 }
 0x32d   : > { %v3545_v22 = vmax.f32 %v3493_v5, %v3525_v37  ;;  %3561 = vst [vmem:[%s163_s7 + $0x18] sm:$0xff] %v3553_v23 }
 0x32e   : > { %v3495_v56 = vld [vmem:[#allocation2 + $0xc0] ss:$2 sm:$0xff]  ;;  %v3527_v30 = vld [vmem:[#allocation2 + $0xc1] ss:$2 sm:$0xff]  ;;  %3562 = vst [vmem:[%s163_s7 + $0x20] sm:$0xff] %v3554_v15 }
 0x32f   : > { %v3546_v47 = vmax.f32 %v3495_v56, %v3527_v30  ;;  %v3555_v63 = vmax.f32 %v3544_v40, %v3545_v22  ;;  %3565 = vst [vmem:[%s163_s7 + $0x38] sm:$0xff] %v3557_v49 }
 0x330   : > { %v3497_v59 = vld [vmem:[#allocation2 + $0xd0] ss:$2 sm:$0xff]  ;;  %v3529_v36 = vld [vmem:[#allocation2 + $0xd1] ss:$2 sm:$0xff] }
 0x331   : > { %v3547_v48 = vmax.f32 %v3497_v59, %v3529_v36  ;;  %3563 = vst [vmem:[%s163_s7 + $0x28] sm:$0xff] %v3555_v63 }
 0x333   : > { %v3556_v13 = vmax.f32 %v3546_v47, %v3547_v48 }
 0x335   : > { %3564 = vst [vmem:[%s163_s7 + $0x30] sm:$0xff] %v3556_v13 }
 0x336   : > { %4228 = shalt.err (!%p4225_p3)
}
 0x337   : > { %s4265_s29 = smov 128   ;;  %s4266_s30 = smov 8  }
 0x338   : > { %4157 = dma.vmem_to_hbm [thread:$0]  (%p4325_p5), %s3580_s16, 1024, %s3582_s11, %s3567_s17, %s4265_s29, %s4265_s29, %s4266_s30  }
 0x339 PF: > { %p4163_p4 = scmp.ge.s32.totalorder %s4263_s15, 2  ;;  %s3596_s4 = sand.u32 1, %s4251_s12  }
 0x33a   : > { %s3597_s5 = scalar_lea.sflag [#allocation4], %s3596_s4 }
 0x33b   : > { %p4160_p7 = pnand %p4163_p4, %p4329_p6 }
 0x33d   : > { %p4161_p8 = pneg %p4160_p7 }
 0x33f   : > { %4246 = dma.done.wait (%p4161_p8), %s3597_s5, 1024  }
 0x340   : > { %4248 = vsyncadd (%p4161_p8), %s3597_s5, 4294966272  ;;  %p13_p9 = scmp.ge.s32.totalorder %s4312_s18, 4   ;;  %s5427_s12 = smov %s4255_s13 }
 0x341   : > { %s5428_s13 = smov %s4259_s14  ;;  %s5429_s14 = smov %s4323_s21 }
 0x342   : > { %s5430_s15 = smov %s4312_s18  ;;  %15 = sbr.rel (!%p13_p9) target bundleno = 3 (0x3), region = 108 }
 0x347   :  { %3603 = vsyncpa [#allocation4], 1 }
 0x348   :  { %3605 = vsyncpa [#allocation4 + $0x1], 1 }

</bundles_post_ra>
